<compile_context>
chip_gen: v5e
topology: v5e:2x2
jax: 0.10.0
libtpu: 0.0.40
codegen_flags: <defaults>
</compile_context>

<pallas_src>
import jax
import jax.numpy as jnp
from jax.experimental import pallas as pl
from jax.experimental.pallas import tpu as pltpu

_BN_EPS = 1e-5
_ROW_ALIGN = 16  # sublane-dense for f32 (8) and the bf16 cast path (16)


def _round_up(n, m):
    return ((n + m - 1) // m) * m


# ----------------------------------------------------------------------------
# Fused kernel factory.
#
# Ref order:  x, w0, b0, [gamma_i, beta_i, w_i, b_i] * num_hidden, out
# All arrays are single full blocks in VMEM; intermediate activations never
# touch HBM.  n_valid/n_padded are trace-time constants (shape-derived), so
# the row mask / 1/N are baked in — no scalar prefetch needed.
# ----------------------------------------------------------------------------
def _make_mlp_kernel(num_hidden, n_valid, n_padded):
    needs_mask = n_valid != n_padded
    inv_n = 1.0 / float(n_valid)

    def kernel(*refs):
        x_ref = refs[0]
        o_ref = refs[-1]

        # First Linear: bf16 operands on the MXU, f32 accumulation.
        out = (
            jnp.dot(
                x_ref[...].astype(jnp.bfloat16),
                refs[1][...],                        # w0 (bf16)
                preferred_element_type=jnp.float32,
            )
            + refs[2][...]                           # b0 (f32)
        )

        if needs_mask:
            # Padded rows must not contribute to the BN batch statistics.
            row_mask = (
                jax.lax.broadcasted_iota(jnp.int32, (n_padded, 1), 0) < n_valid
            )

        idx = 3
        for _ in range(num_hidden):
            gamma = refs[idx][...]                   # (1, C) f32
            beta = refs[idx + 1][...]                # (1, C) f32
            w = refs[idx + 2]                        # (C, Out) bf16
            b = refs[idx + 3]                        # (1, Out) f32
            idx += 4

            # --- BatchNorm1d (training batch stats), single pass, f32 ---
            stats_src = jnp.where(row_mask, out, 0.0) if needs_mask else out
            s = jnp.sum(stats_src, axis=0, keepdims=True)
            ss = jnp.sum(stats_src * stats_src, axis=0, keepdims=True)
            mean = s * inv_n
            var = jnp.maximum(ss * inv_n - mean * mean, 0.0)  # biased var

            # --- fused normalize + affine + ReLU: one scale/shift pass ---
            scale = gamma * jax.lax.rsqrt(var + _BN_EPS)       # EUP rsqrt
            shift = beta - mean * scale
            y = jnp.maximum(out * scale + shift, 0.0)

            # Next Linear: bf16 operands, f32 accumulation.
            out = (
                jnp.dot(y.astype(jnp.bfloat16), w[...],
                        preferred_element_type=jnp.float32)
                + b[...]
            )

        o_ref[...] = out.astype(o_ref.dtype)

    return kernel


# ----------------------------------------------------------------------------
# Wrapper: one pallas_call for the whole MLP.
# ----------------------------------------------------------------------------
def mlp_forward(x, params):
    # input.contiguous().view(-1, input.size(-1))
    x2 = x.reshape(-1, x.shape[-1]).astype(jnp.float32)
    n_valid = x2.shape[0]
    n_padded = _round_up(n_valid, _ROW_ALIGN)
    if n_padded != n_valid:
        x2 = jnp.pad(x2, ((0, n_padded - n_valid), (0, 0)))

    out_dim = params[-1]["w"].shape[1]

    flat_args = [x2]
    num_hidden = 0
    flops = 0
    transcendentals = 0
    bytes_accessed = x2.size * 4 + n_padded * out_dim * 4
    for layer in params:
        if "gamma" in layer:
            flat_args += [layer["gamma"], layer["beta"], layer["w"], layer["b"]]
            num_hidden += 1
            transcendentals += layer["gamma"].shape[1]        # rsqrt / channel
            bytes_accessed += (layer["gamma"].size + layer["beta"].size) * 4
        else:
            flat_args += [layer["w"], layer["b"]]
        k, m = layer["w"].shape
        flops += 2 * n_padded * k * m
        bytes_accessed += layer["w"].size * 2 + layer["b"].size * 4

    kernel = _make_mlp_kernel(num_hidden, n_valid, n_padded)

    # Per-generation VMEM budget: 75% of physical, capped at 100 MiB.
    # v7x (64 MiB) -> 48 MiB; v5e/v6e (128 MiB) -> 96 MiB.
    try:
        vmem_phys = int(pltpu.get_tpu_info().vmem_capacity_bytes)
    except Exception:
        vmem_phys = 64 * 1024 * 1024
    vmem_limit = min(100 * 1024 * 1024, (vmem_phys * 3) // 4)

    out = pl.pallas_call(
        kernel,
        out_shape=jax.ShapeDtypeStruct((n_padded, out_dim), jnp.float32),
        compiler_params=pltpu.CompilerParams(
            vmem_limit_bytes=int(vmem_limit),
        ),
        cost_estimate=pl.CostEstimate(
            flops=flops,
            transcendentals=transcendentals,
            bytes_accessed=bytes_accessed,
        ),
    )(*flat_args)

    if n_padded != n_valid:
        out = out[:n_valid]
    return out


mlp_forward_jit = jax.jit(mlp_forward)


# ----------------------------------------------------------------------------
# Parameter construction (shapes match the PyTorch module).
#   Linear weights are stored transposed as (in, out) in bf16 (MXU operands);
#   biases / BN affine params stay f32.
# ----------------------------------------------------------------------------
def init_mlp_params(sizes, key):
    depth = len(sizes) - 1
    params = []

    key, k1, k2 = jax.random.split(key, 3)
    bound = 1.0 / float(sizes[0]) ** 0.5
    params.append({
        "w": jax.random.uniform(k1, (sizes[0], sizes[1]), jnp.float32,
                                -bound, bound).astype(jnp.bfloat16),
        "b": jax.random.uniform(k2, (1, sizes[1]), jnp.float32, -bound, bound),
    })
    for i in range(1, depth):
        key, k1, k2 = jax.random.split(key, 3)
        bound = 1.0 / float(sizes[i]) ** 0.5
        params.append({
            # BatchNorm1d default affine init: weight=1, bias=0
            "gamma": jnp.ones((1, sizes[i]), jnp.float32),
            "beta": jnp.zeros((1, sizes[i]), jnp.float32),
            "w": jax.random.uniform(k1, (sizes[i], sizes[i + 1]), jnp.float32,
                                    -bound, bound).astype(jnp.bfloat16),
            "b": jax.random.uniform(k2, (1, sizes[i + 1]), jnp.float32,
                                    -bound, bound),
        })
    return params


# Pure-JAX reference mirroring the kernel numerics (bf16 matmul operands,
# f32 accumulation, f32 BatchNorm batch statistics) — same math as the
# PyTorch module up to bf16 matmul precision.  Operates on the UNPADDED batch.
def mlp_reference(x, params):
    out = x.reshape(-1, x.shape[-1]).astype(jnp.float32)
    for layer in params:
        if "gamma" in layer:
            mean = jnp.mean(out, axis=0, keepdims=True)
            var = jnp.mean((out - mean) ** 2, axis=0, keepdims=True)
            out = (out - mean) * jax.lax.rsqrt(var + _BN_EPS)
            out = out * layer["gamma"] + layer["beta"]
            out = jnp.maximum(out, 0.0)
        out = (
            jnp.dot(out.astype(jnp.bfloat16), layer["w"],
                    preferred_element_type=jnp.float32)
            + layer["b"]
        )
    return out


# TODO(synk): BatchNorm1d running_mean / running_var buffer updates (train-mode
# bookkeeping) are not emitted; only the batch-statistics forward is computed.

if __name__ == "__main__":
    key = jax.random.PRNGKey(0)
    key, xkey, pkey = jax.random.split(key, 3)

    # 3-layer MLP with lane-dense feature sizes; input (3, 25, 128) flattens
    # to N=75 rows — deliberately NOT a multiple of 8/16 so the padding +
    # masked-BN-stats path is exercised and checked against the reference.
    sizes = [128, 256, 256, 128]
    x = jax.random.normal(xkey, (3, 25, sizes[0]), dtype=jnp.float32)

    params = init_mlp_params(sizes, pkey)

    out = mlp_forward_jit(x, params)
    out = jax.block_until_ready(out)

    ref = mlp_reference(x, params)
    assert out.shape == (3 * 25, sizes[-1]), out.shape
    assert bool(jnp.allclose(out, ref, atol=1e-2, rtol=1e-2)), "mismatch vs reference"

    print("KERNEL_OK")
</pallas_src>

<mosaic_0001>
module attributes {stable_mosaic.version = 11 : i64} {
  func.func @kernel(%arg0: memref<80x128xf32, #tpu.memory_space<vmem>>, %arg1: memref<128x256xbf16, #tpu.memory_space<vmem>>, %arg2: memref<1x256xf32, #tpu.memory_space<vmem>>, %arg3: memref<1x256xf32, #tpu.memory_space<vmem>>, %arg4: memref<1x256xf32, #tpu.memory_space<vmem>>, %arg5: memref<256x256xbf16, #tpu.memory_space<vmem>>, %arg6: memref<1x256xf32, #tpu.memory_space<vmem>>, %arg7: memref<1x256xf32, #tpu.memory_space<vmem>>, %arg8: memref<1x256xf32, #tpu.memory_space<vmem>>, %arg9: memref<256x128xbf16, #tpu.memory_space<vmem>>, %arg10: memref<1x128xf32, #tpu.memory_space<vmem>>, %arg11: memref<80x128xf32, #tpu.memory_space<vmem>>) attributes {dimension_semantics = [], scalar_prefetch = 0 : i64, scratch_operands = 0 : i64, tpu.core_type = #tpu.core_type<tc>} {
    %c0 = arith.constant 0 : index
    %c0_0 = arith.constant 0 : index
    %0 = vector.load %arg0[%c0, %c0_0] : memref<80x128xf32, #tpu.memory_space<vmem>>, vector<80x128xf32>
    %1 = arith.truncf %0 : vector<80x128xf32> to vector<80x128xbf16>
    %c0_1 = arith.constant 0 : index
    %c0_2 = arith.constant 0 : index
    %2 = vector.load %arg1[%c0_1, %c0_2] : memref<128x256xbf16, #tpu.memory_space<vmem>>, vector<128x256xbf16>
    %cst = arith.constant dense<0.000000e+00> : vector<80x256xf32>
    %3 = tpu.matmul %1, %2, %cst {dimension_numbers = #tpu.dot_dimension_numbers<[1], [0], [0], [1], [0, 0, 1, 1], [], []>} : vector<80x128xbf16>, vector<128x256xbf16>, vector<80x256xf32> -> vector<80x256xf32>
    %c0_3 = arith.constant 0 : index
    %c0_4 = arith.constant 0 : index
    %4 = vector.load %arg2[%c0_3, %c0_4] : memref<1x256xf32, #tpu.memory_space<vmem>>, vector<1x256xf32>
    %5 = vector.broadcast %4 : vector<1x256xf32> to vector<80x256xf32>
    %6 = arith.addf %3, %5 : vector<80x256xf32>
    %7 = tpu.iota {dimensions = array<i32: 0>} : vector<80x1xi32>
    %c75_i32 = arith.constant 75 : i32
    %8 = vector.broadcast %c75_i32 : i32 to vector<80x1xi32>
    %9 = arith.cmpi slt, %7, %8 : vector<80x1xi32>
    %c0_5 = arith.constant 0 : index
    %c0_6 = arith.constant 0 : index
    %10 = vector.load %arg3[%c0_5, %c0_6] : memref<1x256xf32, #tpu.memory_space<vmem>>, vector<1x256xf32>
    %c0_7 = arith.constant 0 : index
    %c0_8 = arith.constant 0 : index
    %11 = vector.load %arg4[%c0_7, %c0_8] : memref<1x256xf32, #tpu.memory_space<vmem>>, vector<1x256xf32>
    %cst_9 = arith.constant 0.000000e+00 : f32
    %12 = vector.shape_cast %9 : vector<80x1xi1> to vector<80x1xi1>
    %13 = vector.broadcast %12 : vector<80x1xi1> to vector<80x256xi1>
    %14 = vector.broadcast %cst_9 : f32 to vector<80x256xf32>
    %15 = arith.select %13, %6, %14 : vector<80x256xi1>, vector<80x256xf32>
    %cst_10 = arith.constant dense<0.000000e+00> : vector<256xf32>
    %16 = vector.multi_reduction <add>, %15, %cst_10 [0] : vector<80x256xf32> to vector<256xf32>
    %17 = vector.shape_cast %16 : vector<256xf32> to vector<1x256xf32>
    %18 = arith.mulf %15, %15 : vector<80x256xf32>
    %cst_11 = arith.constant dense<0.000000e+00> : vector<256xf32>
    %19 = vector.multi_reduction <add>, %18, %cst_11 [0] : vector<80x256xf32> to vector<256xf32>
    %20 = vector.shape_cast %19 : vector<256xf32> to vector<1x256xf32>
    %cst_12 = arith.constant 0.0133333337 : f32
    %21 = vector.broadcast %cst_12 : f32 to vector<1x256xf32>
    %22 = arith.mulf %17, %21 : vector<1x256xf32>
    %cst_13 = arith.constant 0.0133333337 : f32
    %23 = vector.broadcast %cst_13 : f32 to vector<1x256xf32>
    %24 = arith.mulf %20, %23 : vector<1x256xf32>
    %25 = arith.mulf %22, %22 : vector<1x256xf32>
    %26 = arith.subf %24, %25 : vector<1x256xf32>
    %cst_14 = arith.constant 0.000000e+00 : f32
    %27 = vector.broadcast %cst_14 : f32 to vector<1x256xf32>
    %28 = arith.maximumf %26, %27 : vector<1x256xf32>
    %cst_15 = arith.constant 9.99999974E-6 : f32
    %29 = vector.broadcast %cst_15 : f32 to vector<1x256xf32>
    %30 = arith.addf %28, %29 : vector<1x256xf32>
    %31 = math.rsqrt %30 : vector<1x256xf32>
    %32 = arith.mulf %10, %31 : vector<1x256xf32>
    %33 = arith.mulf %22, %32 : vector<1x256xf32>
    %34 = arith.subf %11, %33 : vector<1x256xf32>
    %35 = vector.broadcast %32 : vector<1x256xf32> to vector<80x256xf32>
    %36 = arith.mulf %6, %35 : vector<80x256xf32>
    %37 = vector.broadcast %34 : vector<1x256xf32> to vector<80x256xf32>
    %38 = arith.addf %36, %37 : vector<80x256xf32>
    %cst_16 = arith.constant 0.000000e+00 : f32
    %39 = vector.broadcast %cst_16 : f32 to vector<80x256xf32>
    %40 = arith.maximumf %38, %39 : vector<80x256xf32>
    %41 = arith.truncf %40 : vector<80x256xf32> to vector<80x256xbf16>
    %c0_17 = arith.constant 0 : index
    %c0_18 = arith.constant 0 : index
    %42 = vector.load %arg5[%c0_17, %c0_18] : memref<256x256xbf16, #tpu.memory_space<vmem>>, vector<256x256xbf16>
    %cst_19 = arith.constant dense<0.000000e+00> : vector<80x256xf32>
    %43 = tpu.matmul %41, %42, %cst_19 {dimension_numbers = #tpu.dot_dimension_numbers<[1], [0], [0], [1], [0, 0, 1, 1], [], []>} : vector<80x256xbf16>, vector<256x256xbf16>, vector<80x256xf32> -> vector<80x256xf32>
    %c0_20 = arith.constant 0 : index
    %c0_21 = arith.constant 0 : index
    %44 = vector.load %arg6[%c0_20, %c0_21] : memref<1x256xf32, #tpu.memory_space<vmem>>, vector<1x256xf32>
    %45 = vector.broadcast %44 : vector<1x256xf32> to vector<80x256xf32>
    %46 = arith.addf %43, %45 : vector<80x256xf32>
    %c0_22 = arith.constant 0 : index
    %c0_23 = arith.constant 0 : index
    %47 = vector.load %arg7[%c0_22, %c0_23] : memref<1x256xf32, #tpu.memory_space<vmem>>, vector<1x256xf32>
    %c0_24 = arith.constant 0 : index
    %c0_25 = arith.constant 0 : index
    %48 = vector.load %arg8[%c0_24, %c0_25] : memref<1x256xf32, #tpu.memory_space<vmem>>, vector<1x256xf32>
    %cst_26 = arith.constant 0.000000e+00 : f32
    %49 = vector.shape_cast %9 : vector<80x1xi1> to vector<80x1xi1>
    %50 = vector.broadcast %49 : vector<80x1xi1> to vector<80x256xi1>
    %51 = vector.broadcast %cst_26 : f32 to vector<80x256xf32>
    %52 = arith.select %50, %46, %51 : vector<80x256xi1>, vector<80x256xf32>
    %cst_27 = arith.constant dense<0.000000e+00> : vector<256xf32>
    %53 = vector.multi_reduction <add>, %52, %cst_27 [0] : vector<80x256xf32> to vector<256xf32>
    %54 = vector.shape_cast %53 : vector<256xf32> to vector<1x256xf32>
    %55 = arith.mulf %52, %52 : vector<80x256xf32>
    %cst_28 = arith.constant dense<0.000000e+00> : vector<256xf32>
    %56 = vector.multi_reduction <add>, %55, %cst_28 [0] : vector<80x256xf32> to vector<256xf32>
    %57 = vector.shape_cast %56 : vector<256xf32> to vector<1x256xf32>
    %cst_29 = arith.constant 0.0133333337 : f32
    %58 = vector.broadcast %cst_29 : f32 to vector<1x256xf32>
    %59 = arith.mulf %54, %58 : vector<1x256xf32>
    %cst_30 = arith.constant 0.0133333337 : f32
    %60 = vector.broadcast %cst_30 : f32 to vector<1x256xf32>
    %61 = arith.mulf %57, %60 : vector<1x256xf32>
    %62 = arith.mulf %59, %59 : vector<1x256xf32>
    %63 = arith.subf %61, %62 : vector<1x256xf32>
    %cst_31 = arith.constant 0.000000e+00 : f32
    %64 = vector.broadcast %cst_31 : f32 to vector<1x256xf32>
    %65 = arith.maximumf %63, %64 : vector<1x256xf32>
    %cst_32 = arith.constant 9.99999974E-6 : f32
    %66 = vector.broadcast %cst_32 : f32 to vector<1x256xf32>
    %67 = arith.addf %65, %66 : vector<1x256xf32>
    %68 = math.rsqrt %67 : vector<1x256xf32>
    %69 = arith.mulf %47, %68 : vector<1x256xf32>
    %70 = arith.mulf %59, %69 : vector<1x256xf32>
    %71 = arith.subf %48, %70 : vector<1x256xf32>
    %72 = vector.broadcast %69 : vector<1x256xf32> to vector<80x256xf32>
    %73 = arith.mulf %46, %72 : vector<80x256xf32>
    %74 = vector.broadcast %71 : vector<1x256xf32> to vector<80x256xf32>
    %75 = arith.addf %73, %74 : vector<80x256xf32>
    %cst_33 = arith.constant 0.000000e+00 : f32
    %76 = vector.broadcast %cst_33 : f32 to vector<80x256xf32>
    %77 = arith.maximumf %75, %76 : vector<80x256xf32>
    %78 = arith.truncf %77 : vector<80x256xf32> to vector<80x256xbf16>
    %c0_34 = arith.constant 0 : index
    %c0_35 = arith.constant 0 : index
    %79 = vector.load %arg9[%c0_34, %c0_35] : memref<256x128xbf16, #tpu.memory_space<vmem>>, vector<256x128xbf16>
    %cst_36 = arith.constant dense<0.000000e+00> : vector<80x128xf32>
    %80 = tpu.matmul %78, %79, %cst_36 {dimension_numbers = #tpu.dot_dimension_numbers<[1], [0], [0], [1], [0, 0, 1, 1], [], []>} : vector<80x256xbf16>, vector<256x128xbf16>, vector<80x128xf32> -> vector<80x128xf32>
    %c0_37 = arith.constant 0 : index
    %c0_38 = arith.constant 0 : index
    %81 = vector.load %arg10[%c0_37, %c0_38] : memref<1x128xf32, #tpu.memory_space<vmem>>, vector<1x128xf32>
    %82 = vector.broadcast %81 : vector<1x128xf32> to vector<80x128xf32>
    %83 = arith.addf %80, %82 : vector<80x128xf32>
    %c0_39 = arith.constant 0 : index
    %c0_40 = arith.constant 0 : index
    %84 = vector.load %arg11[%c0_39, %c0_40] : memref<80x128xf32, #tpu.memory_space<vmem>>, vector<80x128xf32>
    tpu.vector_store %arg11[%c0_39, %c0_40], %83 {strides = array<i32>} : memref<80x128xf32, #tpu.memory_space<vmem>>, vector<80x128xf32>,
    return
  }
}

</mosaic_0001>

<bundles_post_ra>
// kernel: mlp_forward.1
= control target key start
LH: loop header
LB: loop body
LE: loop exit
PB: predicated region body
PF: predicated region fallthrough
CT: control target
= control target key end

     0   :  { %16 = vsyncpa [#allocation3], 0  ;;  %s2483_s0 = inlined_call_operand.vmem [shape: f32[80,128], index: 0, kind: input, shape index: {}]   ;;  %s2484_s1 = inlined_call_operand.hbm [shape: bf16[128,256], index: 1, kind: input, shape index: {}]   ;;  %s2485_s2 = inlined_call_operand.vmem [shape: f32[1,256], index: 2, kind: input, shape index: {}]   ;;  %s2486_s3 = inlined_call_operand.vmem [shape: f32[1,256], index: 3, kind: input, shape index: {}]   ;;  %s2487_s4 = inlined_call_operand.vmem [shape: f32[1,256], index: 4, kind: input, shape index: {}]   ;;  %s2488_s5 = inlined_call_operand.vmem [shape: bf16[256,256], index: 5, kind: input, shape index: {}]   ;;  %s2489_s6 = inlined_call_operand.vmem [shape: f32[1,256], index: 6, kind: input, shape index: {}]   ;;  %s2490_s7 = inlined_call_operand.vmem [shape: f32[1,256], index: 7, kind: input, shape index: {}]   ;;  %s2491_s8 = inlined_call_operand.vmem [shape: f32[1,256], index: 8, kind: input, shape index: {}]   ;;  %s2492_s9 = inlined_call_operand.hbm [shape: bf16[256,128], index: 9, kind: input, shape index: {}]   ;;  %s2493_s10 = inlined_call_operand.vmem [shape: f32[1,128], index: 10, kind: input, shape index: {}]   ;;  %s2494_s11 = inlined_call_operand.hbm [shape: f32[80,128], index: 11, kind: output, shape index: {}]  }
   0x1   :  { %17 = vsyncpa [#allocation6], 0 }
   0x2   :  { %18 = vsyncpa [#allocation4], 0  ;;  %s25_s19 = sshll.u32 %s2484_s1, 4  ;;  %s1732_s20 = smov [#allocation2]   ;;  %s26_s19 = int_to_ptr.hbm [resolvable:$true] %s25_s19 }
   0x3   :  { %s27_s21 = sshll.u32 %s1732_s20, 4  ;;  %s52_s24 = sshll.u32 %s2492_s9, 4  ;;  %s28_s21 = int_to_ptr.vmem [resolvable:$true] %s27_s21  ;;  %s53_s24 = int_to_ptr.hbm [resolvable:$true] %s52_s24 }
   0x4   :  { %s1733_s25 = smov 128   ;;  %s1734_s26 = smov 8  }
   0x5   :  { %33 = dma.hbm_to_vmem [thread:$0]  %s26_s19, 2048, %s28_s21, [#allocation3], %s1733_s25, %s1733_s25, %s1734_s26  }
   0x6   :  { %s1735_s27 = smov [#allocation5]   ;;  %s1736_s29 = smov 64  }
   0x7   :  { %s54_s28 = sshll.u32 %s1735_s27, 4  ;;  %s1737_s1 = smov 4   ;;  %s55_s28 = int_to_ptr.vmem [resolvable:$true] %s54_s28 }
   0x8   :  { %60 = dma.hbm_to_vmem [thread:$0]  %s53_s24, 2048, %s55_s28, [#allocation6], %s1736_s29, %s1736_s29, %s1737_s1  }
   0x9   :  { %1726 = dma.done.wait [#allocation3], 2048  }
   0xa   :  { %1727 = vsyncadd [#allocation3], 4294965248 }
   0xb   :  { %1728 = dma.done.wait [#allocation6], 2048  }
   0xc   :  { %1729 = vsyncadd [#allocation6], 4294965248  ;;  %v1376_v0 = vld [vmem:[#allocation2 + $0x70] sm:$0xf]  ;;  %v1589_v1 = vld [vmem:[#allocation2 + $0x74] sm:$0xf0] }
   0xd   :  { %v1588_v2 = vld [vmem:[#allocation2 + $0x74] sm:$0xf]  ;;  %v1377_v3 = vor.u32 %v1589_v1, %v1376_v0  ;;  %v1378_v4 = vld [vmem:[#allocation2 + $0x78] sm:$0xf0]  ;;  %v1368_v5 = vld [vmem:[#allocation2 + $0x60] sm:$0xf] }
   0xe   :  { %v1587_v6 = vld [vmem:[#allocation2 + $0x64] sm:$0xf0]  ;;  %v1381_v7 = vor.u32 %v1588_v2, %v1378_v4  ;;  %v1586_v8 = vld [vmem:[#allocation2 + $0x64] sm:$0xf]  ;;  %v1370_v9 = vld [vmem:[#allocation2 + $0x68] sm:$0xf0] }
   0xf   :  { %188 = vmatpush.bf16.msra.mxu0 %v1377_v3  ;;  %v1369_v10 = vor.u32 %v1587_v6, %v1368_v5  ;;  %v1373_v11 = vor.u32 %v1586_v8, %v1370_v9  ;;  %v1360_v12 = vld [vmem:[#allocation2 + $0x50] sm:$0xf]  ;;  %v1585_v13 = vld [vmem:[#allocation2 + $0x54] sm:$0xf0]  ;;  %v1584_v14 = vld [vmem:[#allocation2 + $0x54] sm:$0xf] }
  0x10   :  { %222 = vmatpush.bf16.msra.mxu1 %v1381_v7  ;;  %v1362_v15 = vld [vmem:[#allocation2 + $0x58] sm:$0xf0]  ;;  %v1361_v16 = vor.u32 %v1585_v13, %v1360_v12  ;;  %v1352_v18 = vld [vmem:[#allocation2 + $0x40] sm:$0xf]  ;;  %v1583_v19 = vld [vmem:[#allocation2 + $0x44] sm:$0xf0] }
  0x11   :  { %v1365_v17 = vor.u32 %v1584_v14, %v1362_v15  ;;  %v1582_v20 = vld [vmem:[#allocation2 + $0x44] sm:$0xf]  ;;  %v1354_v21 = vld [vmem:[#allocation2 + $0x48] sm:$0xf0]  ;;  %v1353_v22 = vor.u32 %v1583_v19, %v1352_v18  ;;  %v1344_v24 = vld [vmem:[#allocation2 + $0x30] sm:$0xf] }
  0x12   :  { %v1357_v23 = vor.u32 %v1582_v20, %v1354_v21  ;;  %v1581_v25 = vld [vmem:[#allocation2 + $0x34] sm:$0xf0]  ;;  %v1580_v26 = vld [vmem:[#allocation2 + $0x34] sm:$0xf]  ;;  %v1346_v27 = vld [vmem:[#allocation2 + $0x38] sm:$0xf0] }
  0x13   :  { %189 = vmatpush.bf16.msra.mxu0 %v1369_v10  ;;  %v1345_v28 = vor.u32 %v1581_v25, %v1344_v24  ;;  %v1349_v29 = vor.u32 %v1580_v26, %v1346_v27  ;;  %v1336_v30 = vld [vmem:[#allocation2 + $0x20] sm:$0xf]  ;;  %v1579_v31 = vld [vmem:[#allocation2 + $0x24] sm:$0xf0]  ;;  %v1578_v32 = vld [vmem:[#allocation2 + $0x24] sm:$0xf] }
  0x14   :  { %223 = vmatpush.bf16.msra.mxu1 %v1373_v11  ;;  %v1338_v33 = vld [vmem:[#allocation2 + $0x28] sm:$0xf0]  ;;  %v1337_v34 = vor.u32 %v1579_v31, %v1336_v30  ;;  %v1328_v36 = vld [vmem:[#allocation2 + $0x10] sm:$0xf]  ;;  %v1577_v37 = vld [vmem:[#allocation2 + $0x14] sm:$0xf0] }
  0x15   :  { %v1341_v35 = vor.u32 %v1578_v32, %v1338_v33  ;;  %v1576_v38 = vld [vmem:[#allocation2 + $0x14] sm:$0xf]  ;;  %v1330_v39 = vld [vmem:[#allocation2 + $0x18] sm:$0xf0]  ;;  %v1329_v40 = vor.u32 %v1577_v37, %v1328_v36  ;;  %v1320_v42 = vld [vmem:[#allocation2] sm:$0xf] }
  0x16   :  { %v1333_v41 = vor.u32 %v1576_v38, %v1330_v39  ;;  %v1575_v43 = vld [vmem:[#allocation2 + $0x4] sm:$0xf0]  ;;  %v1574_v44 = vld [vmem:[#allocation2 + $0x4] sm:$0xf]  ;;  %v1322_v45 = vld [vmem:[#allocation2 + $0x8] sm:$0xf0] }
  0x17   :  { %190 = vmatpush.bf16.msra.mxu0 %v1361_v16  ;;  %v1321_v46 = vor.u32 %v1575_v43, %v1320_v42  ;;  %v71_v47 = vld [vmem:[%s2483_s0] sm:$0xff]  ;;  %v72_v48 = vld [vmem:[%s2483_s0 + $0x8] sm:$0xff]  ;;  %v1325_v49 = vor.u32 %v1574_v44, %v1322_v45  ;;  %v73_v51 = vld [vmem:[%s2483_s0 + $0x10] sm:$0xff]  ;;  %v256_v43 = vlaneseq  ;;  %vm434_vm6 = vcmask 1040384   ;;  %s1304_s22 = sshll.u32 %s2494_s11, 4  ;;  %s1305_s22 = int_to_ptr.hbm [resolvable:$true] %s1304_s22 }
  0x18   :  { %224 = vmatpush.bf16.msra.mxu1 %v1365_v17  ;;  %v81_v50 = vpack.c.bf16 %v72_v48, %v71_v47  ;;  %v74_v52 = vld [vmem:[%s2483_s0 + $0x18] sm:$0xff]  ;;  %v75_v54 = vld [vmem:[%s2483_s0 + $0x20] sm:$0xff]  ;;  %v76_v55 = vld [vmem:[%s2483_s0 + $0x28] sm:$0xff] }
  0x19   :  { %v82_v53 = vpack.c.bf16 %v74_v52, %v73_v51  ;;  %v83_v56 = vpack.c.bf16 %v76_v55, %v75_v54  ;;  %v77_v57 = vld [vmem:[%s2483_s0 + $0x30] sm:$0xff]  ;;  %v78_v58 = vld [vmem:[%s2483_s0 + $0x38] sm:$0xff]  ;;  %v79_v60 = vld [vmem:[%s2483_s0 + $0x40] sm:$0xff] }
  0x1a   :  { %v84_v59 = vpack.c.bf16 %v78_v58, %v77_v57  ;;  %v80_v61 = vld [vmem:[%s2483_s0 + $0x48] sm:$0xff]  ;;  %v1604_v9 = vld [vmem:[%s2488_s5 + $0x74] sm:$0xf]  ;;  %v1442_v10 = vld [vmem:[%s2488_s5 + $0x78] sm:$0xf0] }
  0x1b   :  { %191 = vmatpush.bf16.msra.mxu0 %v1353_v22  ;;  %v85_v62 = vpack.c.bf16 %v80_v61, %v79_v60  ;;  %v1620_v11 = vld [vmem:[%s2488_s5 + $0xf4] sm:$0xf]  ;;  %v1445_v12 = vor.u32 %v1604_v9, %v1442_v10  ;;  %v1506_v13 = vld [vmem:[%s2488_s5 + $0xf8] sm:$0xf0]  ;;  %v102_v17 = vld [vmem:[%s2485_s2] sm:$0x3] }
  0x1c   :  { %225 = vmatpush.bf16.msra.mxu1 %v1357_v23  ;;  %v1509_v15 = vor.u32 %v1620_v11, %v1506_v13  ;;  %v1853_v20 = vperm.slane %v102_v17, 0  ;;  %v1855_v21 = vperm.slane %v102_v17, 1  ;;  %v257_v60 = vshrl.u32 %v256_v43, 7 }
  0x1f   :  { %192 = vmatpush.bf16.msra.mxu0 %v1345_v28 }
  0x20   :  { %226 = vmatpush.bf16.msra.mxu1 %v1349_v29 }
  0x23   :  { %193 = vmatpush.bf16.msra.mxu0 %v1337_v34 }
  0x24   :  { %227 = vmatpush.bf16.msra.mxu1 %v1341_v35 }
  0x27   :  { %194 = vmatpush.bf16.msra.mxu0 %v1329_v40 }
  0x28   :  { %228 = vmatpush.bf16.msra.mxu1 %v1333_v41 }
  0x2b   :  { %195 = vmatpush.bf16.msra.mxu0 %v1321_v46 }
  0x2c   :  { %229 = vmatpush.bf16.msra.mxu1 %v1325_v49 }
  0x2e   :  { %196 = vmatmul.bf16.vlgmr.msra.gmra.mxu0 %v81_v50 }
  0x2f   :  { %230 = vmatmul.bf16.vlgmr.msra.gmra.mxu1 %v81_v50  ;;  %792 = vmatpush.bf16.msrb.mxu0 %v1445_v12  ;;  %v1947_v12 = vadd.s32 72, %v257_v60 }
  0x30   :  { %826 = vmatpush.bf16.msrb.mxu1 %v1509_v15 }
  0x31   :  { %vm276_vm0 = vcmp.lt.s32.totalorder %v1947_v12, 75 }
  0x3e   :  { %201 = vmatmul.bf16.gmra.mxu0 %v82_v53 }
  0x3f   :  { %235 = vmatmul.bf16.gmra.mxu1 %v82_v53 }
  0x4e   :  { %206 = vmatmul.bf16.gmra.mxu0 %v83_v56 }
  0x4f   :  { %240 = vmatmul.bf16.gmra.mxu1 %v83_v56 }
  0x5e   :  { %211 = vmatmul.bf16.gmra.mxu0 %v84_v59 }
  0x5f   :  { %245 = vmatmul.bf16.gmra.mxu1 %v84_v59 }
  0x6e   :  { %216 = vmatmul.bf16.gmra.mxu0 %v85_v62 }
  0x6f   :  { %250 = vmatmul.bf16.gmra.mxu1 %v85_v62 }
  0xab   :  { %v197_v63 = vpop.f32.mrf.mxu0 }
  0xac   :  { %v231_v0 = vpop.f32.mrf.mxu1  ;;  %v1864_v24 = vadd.f32 %v197_v63, %v1853_v20 }
  0xad   :  { %v1870_v26 = vadd.f32 %v231_v0, %v1855_v21 }
  0xae   :  { %v349_v33 = vmul.f32 %v1864_v24, %v1864_v24 }
  0xaf   :  { %v350_v36 = vmul.f32 %v1870_v26, %v1870_v26 }
  0xb3   :  { %v199_v1 = vpop.f32.mrf.mxu0 }
  0xb4   :  { %v233_v2 = vpop.f32.mrf.mxu1  ;;  %v1858_v22 = vadd.f32 %v199_v1, %v1853_v20 }
  0xb5   :  { %v1861_v23 = vadd.f32 %v233_v2, %v1855_v21 }
  0xb6   :  { %v351_v28 = vmul.f32 %v1858_v22, %v1858_v22  ;;  %v319_v37 = vadd.f32 %v1858_v22, %v1864_v24 }
  0xb7   :  { %v352_v30 = vmul.f32 %v1861_v23, %v1861_v23  ;;  %v334_v41 = vadd.f32 %v1861_v23, %v1870_v26 }
  0xb8   :  { %v369_v40 = vadd.f32 %v351_v28, %v349_v33 }
  0xb9   :  { %v384_v44 = vadd.f32 %v352_v30, %v350_v36 }
  0xbb   :  { %v202_v3 = vpop.f32.mrf.mxu0 }
  0xbc   :  { %v236_v4 = vpop.f32.mrf.mxu1  ;;  %v1867_v25 = vadd.f32 %v202_v3, %v1853_v20 }
  0xbd   :  { %v1873_v27 = vadd.f32 %v236_v4, %v1855_v21 }
  0xbe   :  { %v353_v34 = vmul.f32 %v1867_v25, %v1867_v25  ;;  %v320_v45 = vadd.f32 %v319_v37, %v1867_v25 }
  0xbf   :  { %v354_v38 = vmul.f32 %v1873_v27, %v1873_v27  ;;  %v335_v49 = vadd.f32 %v334_v41, %v1873_v27 }
  0xc0   :  { %v370_v48 = vadd.f32 %v369_v40, %v353_v34 }
  0xc1   :  { %v385_v52 = vadd.f32 %v384_v44, %v354_v38 }
  0xc3   :  { %v204_v5 = vpop.f32.mrf.mxu0 }
  0xc4   :  { %v238_v6 = vpop.f32.mrf.mxu1  ;;  %v1880_v31 = vadd.f32 %v204_v5, %v1853_v20 }
  0xc5   :  { %v1887_v35 = vadd.f32 %v238_v6, %v1855_v21 }
  0xc6   :  { %v355_v46 = vmul.f32 %v1880_v31, %v1880_v31  ;;  %v321_v53 = vadd.f32 %v320_v45, %v1880_v31 }
  0xc7   :  { %v356_v50 = vmul.f32 %v1887_v35, %v1887_v35  ;;  %v336_v56 = vadd.f32 %v335_v49, %v1887_v35 }
  0xc8   :  { %v371_v61 = vadd.f32 %v370_v48, %v355_v46 }
  0xc9   :  { %v386_v1 = vadd.f32 %v385_v52, %v356_v50  ;;  %v1440_v50 = vld [vmem:[%s2488_s5 + $0x70] sm:$0xf] }
  0xcb   :  { %v207_v7 = vpop.f32.mrf.mxu0 }
  0xcc   :  { %v241_v8 = vpop.f32.mrf.mxu1  ;;  %v1896_v39 = vadd.f32 %v207_v7, %v1853_v20 }
  0xcd   :  { %v1901_v42 = vadd.f32 %v241_v8, %v1855_v21 }
  0xce   :  { %v357_v54 = vmul.f32 %v1896_v39, %v1896_v39  ;;  %v322_v2 = vadd.f32 %v321_v53, %v1896_v39 }
  0xcf   :  { %v358_v57 = vmul.f32 %v1901_v42, %v1901_v42  ;;  %v337_v3 = vadd.f32 %v336_v56, %v1901_v42  ;;  %v1504_v56 = vld [vmem:[%s2488_s5 + $0xf0] sm:$0xf] }
  0xd0   :  { %v372_v5 = vadd.f32 %v371_v61, %v357_v54 }
  0xd1   :  { %v387_v9 = vadd.f32 %v386_v1, %v358_v57  ;;  %v1621_v57 = vld [vmem:[%s2488_s5 + $0xf4] sm:$0xf0] }
  0xd3   :  { %v209_v14 = vpop.f32.mrf.mxu0 }
  0xd4   :  { %v243_v16 = vpop.f32.mrf.mxu1  ;;  %v1907_v47 = vadd.f32 %v209_v14, %v1853_v20 }
  0xd5   :  { %v1913_v51 = vadd.f32 %v243_v16, %v1855_v21 }
  0xd6   :  { %v359_v62 = vmul.f32 %v1907_v47, %v1907_v47  ;;  %v323_v10 = vadd.f32 %v322_v2, %v1907_v47 }
  0xd7   :  { %v360_v4 = vmul.f32 %v1913_v51, %v1913_v51  ;;  %v338_v14 = vadd.f32 %v337_v3, %v1913_v51 }
  0xd8   :  { %v373_v13 = vadd.f32 %v372_v5, %v359_v62  ;;  %v1505_v62 = vor.u32 %v1621_v57, %v1504_v56  ;;  %v1434_v5 = vld [vmem:[%s2488_s5 + $0x68] sm:$0xf0]  ;;  %v1601_v56 = vld [vmem:[%s2488_s5 + $0x54] sm:$0xf0] }
  0xd9   :  { %v388_v17 = vadd.f32 %v387_v9, %v360_v4  ;;  %v1602_v4 = vld [vmem:[%s2488_s5 + $0x64] sm:$0xf] }
  0xda   :  { %758 = vmatpush.bf16.msra.mxu3 %v1505_v62 }
  0xdb   :  { %v212_v18 = vpop.f32.mrf.mxu0 }
  0xdc   :  { %v246_v19 = vpop.f32.mrf.mxu1  ;;  %v1919_v55 = vadd.f32 %v212_v18, %v1853_v20 }
  0xdd   :  { %v1925_v58 = vadd.f32 %v246_v19, %v1855_v21 }
  0xde   :  { %v361_v6 = vmul.f32 %v1919_v55, %v1919_v55  ;;  %v324_v18 = vadd.f32 %v323_v10, %v1919_v55  ;;  %v1437_v10 = vor.u32 %v1602_v4, %v1434_v5  ;;  %v1482_v4 = vld [vmem:[%s2488_s5 + $0xc8] sm:$0xf0] }
  0xdf   :  { %v362_v11 = vmul.f32 %v1925_v58, %v1925_v58  ;;  %v339_v28 = vadd.f32 %v338_v14, %v1925_v58 }
  0xe0   :  { %v374_v19 = vadd.f32 %v373_v13, %v361_v6  ;;  %v1498_v13 = vld [vmem:[%s2488_s5 + $0xe8] sm:$0xf0]  ;;  %793 = vmatpush.bf16.msrb.mxu0 %v1437_v10  ;;  %v1488_v10 = vld [vmem:[%s2488_s5 + $0xd0] sm:$0xf] }
  0xe3   :  { %v214_v29 = vpop.f32.mrf.mxu0 }
  0xe4   :  { %v248_v32 = vpop.f32.mrf.mxu1  ;;  %v1930_v63 = vadd.f32 %v214_v29, %v1853_v20 }
  0xe5   :  { %v1939_v7 = vadd.f32 %v248_v32, %v1855_v21  ;;  %v389_v32 = vadd.f32 %v388_v17, %v362_v11  ;;  %v1618_v11 = vld [vmem:[%s2488_s5 + $0xe4] sm:$0xf] }
  0xe6   :  { %v363_v15 = vmul.f32 %v1930_v63, %v1930_v63  ;;  %v325_v33 = vadd.f32 %v324_v18, %v1930_v63  ;;  %v1501_v17 = vor.u32 %v1618_v11, %v1498_v13  ;;  %v1432_v18 = vld [vmem:[%s2488_s5 + $0x60] sm:$0xf]  ;;  %v1617_v11 = vld [vmem:[%s2488_s5 + $0xd4] sm:$0xf0] }
  0xe7   :  { %v364_v29 = vmul.f32 %v1939_v7, %v1939_v7  ;;  %v340_v37 = vadd.f32 %v339_v28, %v1939_v7 }
  0xe8   :  { %v375_v36 = vadd.f32 %v374_v19, %v363_v15  ;;  %v1603_v19 = vld [vmem:[%s2488_s5 + $0x64] sm:$0xf0]  ;;  %827 = vmatpush.bf16.msrb.mxu1 %v1501_v17  ;;  %v1416_v17 = vld [vmem:[%s2488_s5 + $0x40] sm:$0xf] }
  0xe9   :  { %v390_v45 = vadd.f32 %v389_v32, %v364_v29  ;;  %v1496_v32 = vld [vmem:[%s2488_s5 + $0xe0] sm:$0xf] }
  0xeb   :  { %v217_v59 = vpop.f32.mrf.mxu0 }
  0xec   :  { %v251_v0 = vpop.f32.mrf.mxu1  ;;  %v1942_v8 = vadd.f32 %v217_v59, %v1853_v20 }
  0xed   :  { %v1953_v16 = vadd.f32 %v251_v0, %v1855_v21 }
  0xee   :  { %v365_v30 = vmul.f32 %v1942_v8, %v1942_v8  ;;  %v326_v43 = vadd.f32 %v325_v33, %v1942_v8  ;;  %v1619_v33 = vld [vmem:[%s2488_s5 + $0xe4] sm:$0xf0] }
  0xef   :  { %v366_v38 = vmul.f32 %v1953_v16, %v1953_v16  ;;  %v341_v48 = vadd.f32 %v340_v37, %v1953_v16  ;;  %v1600_v37 = vld [vmem:[%s2488_s5 + $0x54] sm:$0xf] }
  0xf0   :  { %v376_v46 = vadd.f32 %v375_v36, %v365_v30  ;;  %v1433_v30 = vor.u32 %v1603_v19, %v1432_v18  ;;  %v1599_v18 = vld [vmem:[%s2488_s5 + $0x44] sm:$0xf0] }
  0xf1   :  { %v391_v59 = vadd.f32 %v390_v45, %v366_v38  ;;  %v1426_v38 = vld [vmem:[%s2488_s5 + $0x58] sm:$0xf0] }
  0xf3   :  { %v219_v34 = vpop.f32.mrf.mxu0 }
  0xf4   :  { %v1967_v40 = vadd.f32 %v219_v34, %v1853_v20  ;;  %v253_v41 = vpop.f32.mrf.mxu1  ;;  %v1605_v20 = vld [vmem:[%s2488_s5 + $0x74] sm:$0xf0] }
  0xf5   :  { %v1971_v44 = vadd.f32 %v253_v41, %v1855_v21  ;;  %v1441_v54 = vor.u32 %v1605_v20, %v1440_v50  ;;  %v1497_v41 = vor.u32 %v1619_v33, %v1496_v32  ;;  %v1417_v32 = vor.u32 %v1599_v18, %v1416_v17  ;;  %v1394_v17 = vld [vmem:[%s2488_s5 + $0x18] sm:$0xf0] }
  0xf6   :  { %v317_v49 = vsel %vm276_vm0, %v1967_v40, 0.0 }
  0xf7   :  { %v327_v52 = vadd.f32 %v326_v43, %v317_v49  ;;  %v367_v53 = vmul.f32 %v317_v49, %v317_v49  ;;  %v318_v21 = vsel %vm276_vm0, %v1971_v44, 0.0  ;;  %724 = vmatpush.bf16.msra.mxu2 %v1441_v54  ;;  %v1490_v49 = vld [vmem:[%s2488_s5 + $0xd8] sm:$0xf0]  ;;  %759 = vmatpush.bf16.msra.mxu3 %v1497_v41  ;;  %v1424_v54 = vld [vmem:[%s2488_s5 + $0x50] sm:$0xf] }
  0xf8   :  { %v342_v60 = vadd.f32 %v341_v48, %v318_v21  ;;  %v368_v61 = vmul.f32 %v318_v21, %v318_v21  ;;  %v1616_v48 = vld [vmem:[%s2488_s5 + $0xd4] sm:$0xf]  ;;  %v1425_v62 = vor.u32 %v1601_v56, %v1424_v54  ;;  %v1594_v54 = vld [vmem:[%s2488_s5 + $0x24] sm:$0xf]  ;;  %v1402_v56 = vld [vmem:[%s2488_s5 + $0x28] sm:$0xf0] }
  0xf9   :  { %v328_v0 = vrot.slane %v327_v52, 4  ;;  %v377_v1 = vadd.f32 %v376_v46, %v367_v53  ;;  %v1429_v46 = vor.u32 %v1600_v37, %v1426_v38  ;;  %v1612_v37 = vld [vmem:[%s2488_s5 + $0xb4] sm:$0xf]  ;;  %v1474_v38 = vld [vmem:[%s2488_s5 + $0xb8] sm:$0xf0] }
  0xfa   :  { %v343_v2 = vrot.slane %v342_v60, 4  ;;  %v392_v3 = vadd.f32 %v391_v59, %v368_v61  ;;  %v1418_v61 = vld [vmem:[%s2488_s5 + $0x48] sm:$0xf0] }
  0xfb   :  { %v329_v6 = vadd.f32 %v328_v0, %v327_v52  ;;  %v378_v9 = vrot.slane %v377_v1, 4  ;;  %725 = vmatpush.bf16.msra.mxu2 %v1433_v30  ;;  %v1493_v52 = vor.u32 %v1616_v48, %v1490_v49  ;;  %794 = vmatpush.bf16.msrb.mxu0 %v1429_v46  ;;  %v1410_v30 = vld [vmem:[%s2488_s5 + $0x38] sm:$0xf0]  ;;  %v1480_v46 = vld [vmem:[%s2488_s5 + $0xc0] sm:$0xf] }
  0xfc   :  { %v344_v14 = vadd.f32 %v343_v2, %v342_v60  ;;  %v393_v15 = vrot.slane %v392_v3, 4  ;;  %v1598_v60 = vld [vmem:[%s2488_s5 + $0x44] sm:$0xf]  ;;  %v1615_v48 = vld [vmem:[%s2488_s5 + $0xc4] sm:$0xf0] }
  0xfd   :  { %v330_v28 = vrot.slane %v329_v6, 2  ;;  %v379_v29 = vadd.f32 %v378_v9, %v377_v1  ;;  %828 = vmatpush.bf16.msrb.mxu1 %v1493_v52  ;;  %v1421_v2 = vor.u32 %v1598_v60, %v1418_v61  ;;  %v1597_v52 = vld [vmem:[%s2488_s5 + $0x34] sm:$0xf0]  ;;  %v1405_v61 = vor.u32 %v1594_v54, %v1402_v56  ;;  %v1607_v54 = vld [vmem:[%s2488_s5 + $0x84] sm:$0xf0] }
  0xfe   :  { %v345_v34 = vrot.slane %v344_v14, 2  ;;  %v394_v36 = vadd.f32 %v393_v15, %v392_v3  ;;  %v1614_v3 = vld [vmem:[%s2488_s5 + $0xc4] sm:$0xf]  ;;  %v1489_v15 = vor.u32 %v1617_v11, %v1488_v10  ;;  %v1464_v10 = vld [vmem:[%s2488_s5 + $0xa0] sm:$0xf] }
  0xff   :  { %v331_v43 = vadd.f32 %v330_v28, %v329_v6  ;;  %v380_v45 = vrot.slane %v379_v29, 2  ;;  %v1485_v9 = vor.u32 %v1614_v3, %v1482_v4  ;;  %726 = vmatpush.bf16.msra.mxu2 %v1425_v62  ;;  %795 = vmatpush.bf16.msrb.mxu0 %v1421_v2  ;;  %v1466_v62 = vld [vmem:[%s2488_s5 + $0xa8] sm:$0xf0]  ;;  %v1400_v4 = vld [vmem:[%s2488_s5 + $0x20] sm:$0xf] }
 0x100   :  { %v346_v50 = vadd.f32 %v345_v34, %v344_v14  ;;  %v395_v20 = vrot.slane %v394_v36, 2  ;;  %760 = vmatpush.bf16.msra.mxu3 %v1489_v15  ;;  %v1611_v11 = vld [vmem:[%s2488_s5 + $0xa4] sm:$0xf0]  ;;  %v1592_v15 = vld [vmem:[%s2488_s5 + $0x14] sm:$0xf] }
 0x101   :  { %v332_v53 = vrot.slane %v331_v43, 1  ;;  %v381_v21 = vadd.f32 %v380_v45, %v379_v29  ;;  %829 = vmatpush.bf16.msrb.mxu1 %v1485_v9  ;;  %v1596_v29 = vld [vmem:[%s2488_s5 + $0x34] sm:$0xf]  ;;  %v1477_v45 = vor.u32 %v1612_v37, %v1474_v38  ;;  %v1397_v18 = vor.u32 %v1592_v15, %v1394_v17  ;;  %v1609_v37 = vld [vmem:[%s2488_s5 + $0x94] sm:$0xf0] }
 0x102   :  { %v347_v57 = vrot.slane %v346_v50, 1  ;;  %v396_v59 = vadd.f32 %v395_v20, %v394_v36  ;;  %v1413_v36 = vor.u32 %v1596_v29, %v1410_v30  ;;  %v1408_v20 = vld [vmem:[%s2488_s5 + $0x30] sm:$0xf]  ;;  %v1458_v29 = vld [vmem:[%s2488_s5 + $0x98] sm:$0xf0]  ;;  %v1465_v30 = vor.u32 %v1611_v11, %v1464_v10 }
 0x103   :  { %v333_v0 = vadd.f32 %v332_v53, %v331_v43  ;;  %v382_v1 = vrot.slane %v381_v21, 1  ;;  %727 = vmatpush.bf16.msra.mxu2 %v1417_v32  ;;  %v1472_v53 = vld [vmem:[%s2488_s5 + $0xb0] sm:$0xf]  ;;  %v277_v11 = vld [vmem:[%s2486_s3] sm:$0x3] }
 0x104   :  { %v348_v5 = vadd.f32 %v347_v57, %v346_v50  ;;  %v397_v6 = vrot.slane %v396_v59, 1  ;;  %796 = vmatpush.bf16.msrb.mxu0 %v1413_v36  ;;  %v1481_v50 = vor.u32 %v1615_v48, %v1480_v46  ;;  %v1610_v57 = vld [vmem:[%s2488_s5 + $0xa4] sm:$0xf]  ;;  %v1392_v32 = vld [vmem:[%s2488_s5 + $0x10] sm:$0xf] }
 0x105   :  { %v383_v13 = vadd.f32 %v382_v1, %v381_v21  ;;  %v2052_v14 = vmul.f32 0.013333334, %v333_v0  ;;  %830 = vmatpush.bf16.msrb.mxu1 %v1477_v45  ;;  %v1613_v0 = vld [vmem:[%s2488_s5 + $0xb4] sm:$0xf0]  ;;  %v1469_v2 = vor.u32 %v1610_v57, %v1466_v62  ;;  %v1456_v36 = vld [vmem:[%s2488_s5 + $0x90] sm:$0xf] }
 0x106   :  { %v398_v19 = vadd.f32 %v397_v6, %v396_v59  ;;  %v2060_v28 = vmul.f32 0.013333334, %v348_v5  ;;  %v1409_v59 = vor.u32 %v1597_v52, %v1408_v20  ;;  %761 = vmatpush.bf16.msra.mxu3 %v1481_v50  ;;  %v1473_v3 = vor.u32 %v1613_v0, %v1472_v53  ;;  %v1595_v5 = vld [vmem:[%s2488_s5 + $0x24] sm:$0xf0]  ;;  %v1606_v45 = vld [vmem:[%s2488_s5 + $0x84] sm:$0xf] }
 0x107   :  { %v401_v33 = vmul.f32 0.013333334, %v383_v13  ;;  %v403_v34 = vmul.f32 %v2052_v14, %v2052_v14  ;;  %v1401_v9 = vor.u32 %v1595_v5, %v1400_v4  ;;  %v1450_v48 = vld [vmem:[%s2488_s5 + $0x88] sm:$0xf0]  ;;  %v1591_v50 = vld [vmem:[%s2488_s5 + $0x4] sm:$0xf0]  ;;  %v1457_v20 = vor.u32 %v1609_v37, %v1456_v36 }
 0x108   :  { %v402_v41 = vmul.f32 0.013333334, %v398_v19  ;;  %v404_v43 = vmul.f32 %v2060_v28, %v2060_v28  ;;  %728 = vmatpush.bf16.msra.mxu2 %v1409_v59  ;;  %797 = vmatpush.bf16.msrb.mxu0 %v1405_v61  ;;  %v1608_v19 = vld [vmem:[%s2488_s5 + $0x94] sm:$0xf]  ;;  %v1453_v52 = vor.u32 %v1606_v45, %v1450_v48 }
 0x109   :  { %v405_v49 = vsub.f32 %v401_v33, %v403_v34  ;;  %831 = vmatpush.bf16.msrb.mxu1 %v1469_v2  ;;  %v1461_v33 = vor.u32 %v1608_v19, %v1458_v29  ;;  %v1593_v34 = vld [vmem:[%s2488_s5 + $0x14] sm:$0xf0] }
 0x10a   :  { %v406_v21 = vsub.f32 %v402_v41, %v404_v43  ;;  %762 = vmatpush.bf16.msra.mxu3 %v1473_v3  ;;  %v1393_v38 = vor.u32 %v1593_v34, %v1392_v32  ;;  %v1590_v41 = vld [vmem:[%s2488_s5 + $0x4] sm:$0xf]  ;;  %v1386_v43 = vld [vmem:[%s2488_s5 + $0x8] sm:$0xf0]  ;;  %v278_v32 = vld [vmem:[%s2487_s4] sm:$0x3] }
 0x10b   :  { %v407_v60 = vmax.f32 %v405_v49, 0.0  ;;  %v1389_v46 = vor.u32 %v1590_v41, %v1386_v43  ;;  %v1384_v49 = vld [vmem:[%s2488_s5] sm:$0xf] }
 0x10c   :  { %v408_v1 = vmax.f32 %v406_v21, 0.0  ;;  %729 = vmatpush.bf16.msra.mxu2 %v1401_v9  ;;  %798 = vmatpush.bf16.msrb.mxu0 %v1397_v18  ;;  %v1385_v53 = vor.u32 %v1591_v50, %v1384_v49  ;;  %v1448_v21 = vld [vmem:[%s2488_s5 + $0x80] sm:$0xf] }
 0x10d   :  { %v2114_v6 = vadd.f32 1e-05, %v407_v60  ;;  %832 = vmatpush.bf16.msrb.mxu1 %v1461_v33  ;;  %v1449_v61 = vor.u32 %v1607_v54, %v1448_v21 }
 0x10e   :  { %v410_v13 = vadd.f32 1e-05, %v408_v1  ;;  %763 = vmatpush.bf16.msra.mxu3 %v1465_v30 }
 0x10f   :  { %1646 = vrsqrt.f32 %v2114_v6  ;;  %vm417_vm5 = vweird.f32 %v2114_v6 }
 0x110   :  { %1648 = vrsqrt.f32 %v410_v13  ;;  %730 = vmatpush.bf16.msra.mxu2 %v1393_v38  ;;  %799 = vmatpush.bf16.msrb.mxu0 %v1389_v46  ;;  %vm427_vm3 = vweird.f32 %v410_v13 }
 0x111   :  { %833 = vmatpush.bf16.msrb.mxu1 %v1453_v52 }
 0x112   :  { %764 = vmatpush.bf16.msra.mxu3 %v1457_v20 }
 0x114   :  { %731 = vmatpush.bf16.msra.mxu2 %v1385_v53 }
 0x115   :  { %v1647_v56 = vpop.eup %1646 }
 0x116   :  { %v1649_v57 = vpop.eup %1648  ;;  %v412_v59 = vmul.f32 %v1647_v56, %v2114_v6  ;;  %765 = vmatpush.bf16.msra.mxu3 %v1449_v61  ;;  %vm418_vm2 = vweird.f32 %v1647_v56 }
 0x117   :  { %v422_v60 = vmul.f32 %v1649_v57, %v410_v13  ;;  %vm428_vm1 = vweird.f32 %v1649_v57  ;;  %vm419_vm7 = vmor %vm417_vm5, %vm418_vm2 }
 0x118   :  { %v413_v62 = vmul.f32 %v1647_v56, %v412_v59  ;;  %vm429_vm4 = vmor %vm427_vm3, %vm428_vm1 }
 0x119   :  { %v423_v0 = vmul.f32 %v1649_v57, %v422_v60 }
 0x11a   :  { %v414_v1 = vmul.f32 0.5, %v413_v62 }
 0x11b   :  { %v424_v2 = vmul.f32 0.5, %v423_v0 }
 0x11c   :  { %v415_v3 = vsub.f32 1.5, %v414_v1 }
 0x11d   :  { %v425_v4 = vsub.f32 1.5, %v424_v2 }
 0x11e   :  { %v416_v5 = vmul.f32 %v1647_v56, %v415_v3 }
 0x11f   :  { %v426_v9 = vmul.f32 %v1649_v57, %v425_v4 }
 0x120   :  { %v420_v17 = vsel %vm419_vm7, %v1647_v56, %v416_v5 }
 0x121   :  { %v430_v10 = vsel %vm429_vm4, %v1649_v57, %v426_v9 }
 0x122   :  { %v433_v15 = vrot.slane %v430_v10, 7 }
 0x124   :  { %v435_v18 = vsel %vm434_vm6, %v420_v17, %v433_v15 }
 0x125   :  { %v437_v19 = vmul.f32 %v435_v18, %v277_v11 }
 0x127   :  { %v2177_v29 = vperm.slane %v437_v19, 0  ;;  %v2179_v30 = vperm.slane %v437_v19, 1 }
 0x129   :  { %v444_v13 = vmul.f32 %v2179_v30, %v2060_v28  ;;  %v470_v6 = vmul.f32 %v2179_v30, %v1971_v44  ;;  %v443_v33 = vmul.f32 %v2177_v29, %v2052_v14  ;;  %v467_v38 = vmul.f32 %v2177_v29, %v1942_v8 }
 0x12a   :  { %v469_v28 = vmul.f32 %v2177_v29, %v1967_v40  ;;  %v451_v44 = vmul.f32 %v2177_v29, %v1864_v24  ;;  %v453_v41 = vmul.f32 %v2177_v29, %v1858_v22  ;;  %v468_v43 = vmul.f32 %v2179_v30, %v1953_v16 }
 0x12b   :  { %v447_v34 = vrot.slane %v444_v13, 7  ;;  %v452_v46 = vmul.f32 %v2179_v30, %v1870_v26  ;;  %v454_v8 = vmul.f32 %v2179_v30, %v1861_v23  ;;  %v455_v26 = vmul.f32 %v2177_v29, %v1867_v25 }
 0x12c   :  { %v457_v21 = vmul.f32 %v2177_v29, %v1880_v31  ;;  %v456_v54 = vmul.f32 %v2179_v30, %v1873_v27  ;;  %v458_v57 = vmul.f32 %v2179_v30, %v1887_v35  ;;  %v459_v17 = vmul.f32 %v2177_v29, %v1896_v39 }
 0x12d   :  { %v448_v36 = vsel %vm434_vm6, %v443_v33, %v447_v34  ;;  %v461_v18 = vmul.f32 %v2177_v29, %v1907_v47  ;;  %v460_v19 = vmul.f32 %v2179_v30, %v1901_v42  ;;  %v462_v13 = vmul.f32 %v2179_v30, %v1913_v51 }
 0x12e   :  { %v450_v37 = vsub.f32 %v278_v32, %v448_v36  ;;  %v463_v42 = vmul.f32 %v2177_v29, %v1919_v55  ;;  %v465_v51 = vmul.f32 %v2177_v29, %v1930_v63 }
 0x130   :  { %v2201_v14 = vperm.slane %v450_v37, 0  ;;  %v2203_v45 = vperm.slane %v450_v37, 1 }
 0x132   :  { %v476_v40 = vadd.f32 %v2201_v14, %v451_v44  ;;  %v478_v24 = vadd.f32 %v2201_v14, %v453_v41  ;;  %v477_v48 = vadd.f32 %v2203_v45, %v452_v46  ;;  %v479_v22 = vadd.f32 %v2203_v45, %v454_v8 }
 0x133   :  { %v492_v23 = vadd.f32 %v2201_v14, %v467_v38  ;;  %v494_v56 = vadd.f32 %v2201_v14, %v469_v28  ;;  %v493_v60 = vadd.f32 %v2203_v45, %v468_v43  ;;  %v495_v61 = vadd.f32 %v2203_v45, %v470_v6 }
 0x134   :  { %v496_v49 = vmax.f32 %v476_v40, 0.0  ;;  %v498_v16 = vmax.f32 %v478_v24, 0.0  ;;  %v497_v50 = vmax.f32 %v477_v48, 0.0  ;;  %v499_v20 = vmax.f32 %v479_v22, 0.0 }
 0x135   :  { %v512_v59 = vmax.f32 %v492_v23, 0.0  ;;  %v480_v62 = vadd.f32 %v2201_v14, %v455_v26  ;;  %v482_v25 = vadd.f32 %v2201_v14, %v457_v21  ;;  %v514_v0 = vmax.f32 %v494_v56, 0.0 }
 0x136   :  { %v516_v52 = vpack.c.bf16 %v498_v16, %v496_v49  ;;  %v517_v53 = vpack.c.bf16 %v499_v20, %v497_v50  ;;  %v481_v31 = vadd.f32 %v2203_v45, %v456_v54  ;;  %v483_v1 = vadd.f32 %v2203_v45, %v458_v57 }
 0x137   :  { %v513_v27 = vmax.f32 %v493_v60, 0.0  ;;  %v515_v2 = vmax.f32 %v495_v61, 0.0  ;;  %v524_v3 = vpack.c.bf16 %v514_v0, %v512_v59  ;;  %v500_v5 = vmax.f32 %v480_v62, 0.0  ;;  %v1629_v62 = vld [vmem:[#allocation5 + $0x38] sm:$0xff] }
 0x138   :  { %732 = vmatmul.bf16.vlgmr.msra.gmra.mxu2 %v516_v52  ;;  %766 = vmatmul.bf16.vlgmr.msra.gmra.mxu3 %v517_v53  ;;  %v502_v35 = vmax.f32 %v482_v25, 0.0  ;;  %v501_v9 = vmax.f32 %v481_v31, 0.0  ;;  %v503_v10 = vmax.f32 %v483_v1, 0.0  ;;  %v484_v6 = vadd.f32 %v2201_v14, %v459_v17  ;;  %v1637_v25 = vld [vmem:[#allocation5 + $0x78] sm:$0xff] }
 0x139   :  { %800 = vmatmul.bf16.vlgmr.msrb.gmra.mxu0 %v516_v52  ;;  %834 = vmatmul.bf16.vlgmr.msrb.gmra.mxu1 %v517_v53  ;;  %v525_v4 = vpack.c.bf16 %v515_v2, %v513_v27  ;;  %v486_v32 = vadd.f32 %v2201_v14, %v461_v18  ;;  %v485_v33 = vadd.f32 %v2203_v45, %v460_v19  ;;  %v558_v2 = vld [vmem:[%s2489_s6] sm:$0x3] }
 0x13a   :  { %v518_v11 = vpack.c.bf16 %v502_v35, %v500_v5  ;;  %v519_v15 = vpack.c.bf16 %v503_v10, %v501_v9  ;;  %v487_v34 = vadd.f32 %v2203_v45, %v462_v13  ;;  %v504_v36 = vmax.f32 %v484_v6, 0.0  ;;  %1220 = vmatpush.bf16.msrb.mxu2 %v1629_v62  ;;  %1254 = vmatpush.bf16.msrb.mxu3 %v1637_v25 }
 0x13b   :  { %v506_v37 = vmax.f32 %v486_v32, 0.0  ;;  %v505_v39 = vmax.f32 %v485_v33, 0.0  ;;  %v464_v44 = vmul.f32 %v2179_v30, %v1925_v58  ;;  %v466_v41 = vmul.f32 %v2179_v30, %v1939_v7 }
 0x13c   :  { %v507_v38 = vmax.f32 %v487_v34, 0.0  ;;  %v488_v43 = vadd.f32 %v2201_v14, %v463_v42  ;;  %v490_v46 = vadd.f32 %v2201_v14, %v465_v51  ;;  %v2258_v5 = vperm.slane %v558_v2, 1 }
 0x13d   :  { %v520_v28 = vpack.c.bf16 %v506_v37, %v504_v36  ;;  %v489_v8 = vadd.f32 %v2203_v45, %v464_v44  ;;  %v491_v40 = vadd.f32 %v2203_v45, %v466_v41  ;;  %v2260_v35 = vperm.slane %v558_v2, 0 }
 0x13e   :  { %v521_v47 = vpack.c.bf16 %v507_v38, %v505_v39  ;;  %v508_v24 = vmax.f32 %v488_v43, 0.0  ;;  %v510_v48 = vmax.f32 %v490_v46, 0.0 }
 0x13f   :  { %v509_v55 = vmax.f32 %v489_v8, 0.0  ;;  %v511_v22 = vmax.f32 %v491_v40, 0.0 }
 0x140   :  { %v522_v49 = vpack.c.bf16 %v510_v48, %v508_v24 }
 0x141   :  { %v523_v63 = vpack.c.bf16 %v511_v22, %v509_v55 }
 0x148   :  { %737 = vmatmul.bf16.gmra.mxu2 %v518_v11  ;;  %771 = vmatmul.bf16.gmra.mxu3 %v519_v15 }
 0x149   :  { %805 = vmatmul.bf16.gmra.mxu0 %v518_v11  ;;  %839 = vmatmul.bf16.gmra.mxu1 %v519_v15 }
 0x158   :  { %742 = vmatmul.bf16.gmra.mxu2 %v520_v28  ;;  %776 = vmatmul.bf16.gmra.mxu3 %v521_v47 }
 0x159   :  { %810 = vmatmul.bf16.gmra.mxu0 %v520_v28  ;;  %844 = vmatmul.bf16.gmra.mxu1 %v521_v47 }
 0x168   :  { %747 = vmatmul.bf16.gmra.mxu2 %v522_v49  ;;  %781 = vmatmul.bf16.gmra.mxu3 %v523_v63 }
 0x169   :  { %815 = vmatmul.bf16.gmra.mxu0 %v522_v49  ;;  %849 = vmatmul.bf16.gmra.mxu1 %v523_v63 }
 0x178   :  { %752 = vmatmul.bf16.gmra.mxu2 %v524_v3  ;;  %786 = vmatmul.bf16.gmra.mxu3 %v525_v4 }
 0x179   :  { %820 = vmatmul.bf16.gmra.mxu0 %v524_v3  ;;  %854 = vmatmul.bf16.gmra.mxu1 %v525_v4 }
 0x1b6   :  { %v801_v58 = vpop.f32.mrf.mxu0  ;;  %v835_v7 = vpop.f32.mrf.mxu1 }
 0x1b7   :  { %v802_v10 = vadd.f32 %v801_v58, %v2258_v5 }
 0x1b9   :  { %v2272_v34 = vadd.f32 %v835_v7, %v802_v10 }
 0x1bb   :  { %v733_v29 = vpop.f32.mrf.mxu2  ;;  %v767_v30 = vpop.f32.mrf.mxu3  ;;  %v913_v41 = vmul.f32 %v2272_v34, %v2272_v34 }
 0x1bc   :  { %v734_v18 = vadd.f32 %v733_v29, %v2260_v35 }
 0x1be   :  { %v803_v14 = vpop.f32.mrf.mxu0  ;;  %v837_v45 = vpop.f32.mrf.mxu1  ;;  %v2278_v38 = vadd.f32 %v767_v30, %v734_v18 }
 0x1bf   :  { %v804_v9 = vadd.f32 %v803_v14, %v2258_v5 }
 0x1c0   :  { %v912_v48 = vmul.f32 %v2278_v38, %v2278_v38 }
 0x1c1   :  { %v2268_v19 = vadd.f32 %v837_v45, %v804_v9 }
 0x1c3   :  { %v735_v16 = vpop.f32.mrf.mxu2  ;;  %v769_v50 = vpop.f32.mrf.mxu3  ;;  %v915_v28 = vmul.f32 %v2268_v19, %v2268_v19  ;;  %v897_v55 = vadd.f32 %v2268_v19, %v2272_v34 }
 0x1c4   :  { %v736_v13 = vadd.f32 %v735_v16, %v2260_v35 }
 0x1c5   :  { %v947_v63 = vadd.f32 %v915_v28, %v913_v41 }
 0x1c6   :  { %v806_v20 = vpop.f32.mrf.mxu0  ;;  %v840_v52 = vpop.f32.mrf.mxu1  ;;  %v2282_v47 = vadd.f32 %v769_v50, %v736_v13 }
 0x1c7   :  { %v807_v11 = vadd.f32 %v806_v20, %v2258_v5 }
 0x1c8   :  { %v882_v58 = vadd.f32 %v2282_v47, %v2278_v38  ;;  %v914_v7 = vmul.f32 %v2282_v47, %v2282_v47 }
 0x1c9   :  { %v2274_v36 = vadd.f32 %v840_v52, %v807_v11 }
 0x1cb   :  { %v738_v53 = vpop.f32.mrf.mxu2  ;;  %v772_v23 = vpop.f32.mrf.mxu3  ;;  %v917_v43 = vmul.f32 %v2274_v36, %v2274_v36  ;;  %v898_v30 = vadd.f32 %v897_v55, %v2274_v36 }
 0x1cc   :  { %v739_v37 = vadd.f32 %v738_v53, %v2260_v35 }
 0x1cd   :  { %v948_v52 = vadd.f32 %v947_v63, %v917_v43 }
 0x1ce   :  { %v808_v26 = vpop.f32.mrf.mxu0  ;;  %v842_v21 = vpop.f32.mrf.mxu1  ;;  %v2292_v46 = vadd.f32 %v772_v23, %v739_v37 }
 0x1cf   :  { %v809_v6 = vadd.f32 %v808_v26, %v2258_v5 }
 0x1d0   :  { %v916_v53 = vmul.f32 %v2292_v46, %v2292_v46 }
 0x1d1   :  { %v2284_v42 = vadd.f32 %v842_v21, %v809_v6 }
 0x1d3   :  { %v740_v54 = vpop.f32.mrf.mxu2  ;;  %v774_v56 = vpop.f32.mrf.mxu3  ;;  %v919_v29 = vmul.f32 %v2284_v42, %v2284_v42  ;;  %v899_v21 = vadd.f32 %v898_v30, %v2284_v42 }
 0x1d4   :  { %v741_v51 = vadd.f32 %v740_v54, %v2260_v35 }
 0x1d5   :  { %v949_v62 = vadd.f32 %v948_v52, %v919_v29 }
 0x1d6   :  { %v811_v57 = vpop.f32.mrf.mxu0  ;;  %v845_v59 = vpop.f32.mrf.mxu1  ;;  %v2309_v14 = vadd.f32 %v774_v56, %v741_v51 }
 0x1d7   :  { %v812_v39 = vadd.f32 %v811_v57, %v2258_v5 }
 0x1d9   :  { %v2294_v8 = vadd.f32 %v845_v59, %v812_v39  ;;  %v932_v59 = vadd.f32 %v914_v7, %v912_v48 }
 0x1db   :  { %v743_v60 = vpop.f32.mrf.mxu2  ;;  %v777_v61 = vpop.f32.mrf.mxu3  ;;  %v921_v23 = vmul.f32 %v2294_v8, %v2294_v8  ;;  %v933_v2 = vadd.f32 %v932_v59, %v916_v53 }
 0x1dc   :  { %v744_v22 = vadd.f32 %v743_v60, %v2260_v35  ;;  %v883_v60 = vadd.f32 %v882_v58, %v2292_v46 }
 0x1de   :  { %v813_v0 = vpop.f32.mrf.mxu0  ;;  %v847_v31 = vpop.f32.mrf.mxu1  ;;  %v2320_v54 = vadd.f32 %v777_v61, %v744_v22 }
 0x1df   :  { %v814_v44 = vadd.f32 %v813_v0, %v2258_v5  ;;  %v918_v0 = vmul.f32 %v2309_v14, %v2309_v14 }
 0x1e1   :  { %v2311_v45 = vadd.f32 %v847_v31, %v814_v44  ;;  %v900_v31 = vadd.f32 %v899_v21, %v2294_v8  ;;  %v934_v37 = vadd.f32 %v933_v2, %v918_v0 }
 0x1e3   :  { %v745_v1 = vpop.f32.mrf.mxu2  ;;  %v2253_v27 = vpop.f32.mrf.mxu3  ;;  %v901_v18 = vadd.f32 %v900_v31, %v2311_v45 }
 0x1e4   :  { %v746_v26 = vadd.f32 %v745_v1, %v2260_v35  ;;  %v923_v1 = vmul.f32 %v2311_v45, %v2311_v45 }
 0x1e6   :  { %v816_v3 = vpop.f32.mrf.mxu0  ;;  %v850_v4 = vpop.f32.mrf.mxu1 }
 0x1e7   :  { %v817_v49 = vadd.f32 %v816_v3, %v2258_v5  ;;  %v950_v3 = vadd.f32 %v949_v62, %v921_v23 }
 0x1e9   :  { %v2322_v56 = vadd.f32 %v850_v4, %v817_v49  ;;  %v2335_v4 = vadd.f32 %v2253_v27, %v746_v26  ;;  %v951_v39 = vadd.f32 %v950_v3, %v923_v1 }
 0x1eb   :  { %v748_v15 = vpop.f32.mrf.mxu2  ;;  %v2265_v17 = vpop.f32.mrf.mxu3  ;;  %v925_v13 = vmul.f32 %v2322_v56, %v2322_v56  ;;  %v902_v28 = vadd.f32 %v901_v18, %v2322_v56  ;;  %v922_v43 = vmul.f32 %v2335_v4, %v2335_v4 }
 0x1ec   :  { %v749_v25 = vadd.f32 %v748_v15, %v2260_v35  ;;  %v920_v15 = vmul.f32 %v2320_v54, %v2320_v54 }
 0x1ed   :  { %v952_v55 = vadd.f32 %v951_v39, %v925_v13 }
 0x1ee   :  { %v818_v32 = vpop.f32.mrf.mxu0  ;;  %v852_v33 = vpop.f32.mrf.mxu1  ;;  %v935_v48 = vadd.f32 %v934_v37, %v920_v15 }
 0x1ef   :  { %v819_v16 = vadd.f32 %v818_v32, %v2258_v5  ;;  %v884_v32 = vadd.f32 %v883_v60, %v2309_v14 }
 0x1f1   :  { %v2332_v61 = vadd.f32 %v852_v33, %v819_v16  ;;  %v2347_v33 = vadd.f32 %v2265_v17, %v749_v25  ;;  %v885_v41 = vadd.f32 %v884_v32, %v2320_v54  ;;  %v936_v16 = vadd.f32 %v935_v48, %v922_v43 }
 0x1f3   :  { %v750_v40 = vpop.f32.mrf.mxu2  ;;  %v784_v24 = vpop.f32.mrf.mxu3  ;;  %v927_v51 = vmul.f32 %v2332_v61, %v2332_v61  ;;  %v903_v22 = vadd.f32 %v902_v28, %v2332_v61  ;;  %v886_v58 = vadd.f32 %v885_v41, %v2335_v4  ;;  %v924_v7 = vmul.f32 %v2347_v33, %v2347_v33 }
 0x1f4   :  { %v751_v9 = vadd.f32 %v750_v40, %v2260_v35 }
 0x1f5   :  { %v937_v59 = vadd.f32 %v936_v16, %v924_v7 }
 0x1f6   :  { %v821_v50 = vpop.f32.mrf.mxu0  ;;  %v855_v20 = vpop.f32.mrf.mxu1  ;;  %v2356_v40 = vadd.f32 %v784_v24, %v751_v9  ;;  %v953_v24 = vadd.f32 %v952_v55, %v927_v51 }
 0x1f7   :  { %v822_v57 = vadd.f32 %v821_v50, %v2258_v5  ;;  %v887_v50 = vadd.f32 %v886_v58, %v2347_v33 }
 0x1f9   :  { %v2343_v6 = vadd.f32 %v855_v20, %v822_v57  ;;  %v926_v20 = vmul.f32 %v2356_v40, %v2356_v40  ;;  %v888_v60 = vadd.f32 %v887_v50, %v2356_v40 }
 0x1fb   :  { %v753_v10 = vpop.f32.mrf.mxu2  ;;  %v787_v11 = vpop.f32.mrf.mxu3  ;;  %v929_v49 = vmul.f32 %v2343_v6, %v2343_v6  ;;  %v938_v2 = vadd.f32 %v937_v59, %v926_v20  ;;  %v1636_v20 = vld [vmem:[#allocation5 + $0x70] sm:$0xff]  ;;  %v1627_v59 = vld [vmem:[#allocation5 + $0x28] sm:$0xff] }
 0x1fc   :  { %v754_v27 = vadd.f32 %v753_v10, %v2260_v35  ;;  %1255 = vmatpush.bf16.msrb.mxu3 %v1636_v20 }
 0x1fd   :  { %v954_v23 = vadd.f32 %v953_v24, %v929_v49 }
 0x1fe   :  { %v823_v44 = vpop.f32.mrf.mxu0  ;;  %v857_v63 = vpop.f32.mrf.mxu1  ;;  %v2365_v29 = vadd.f32 %v787_v11, %v754_v27 }
 0x1ff   :  { %v824_v17 = vadd.f32 %v823_v44, %v2258_v5  ;;  %v904_v5 = vadd.f32 %v903_v22, %v2343_v6 }
 0x200   :  { %v928_v62 = vmul.f32 %v2365_v29, %v2365_v29  ;;  %v889_v3 = vadd.f32 %v888_v60, %v2365_v29  ;;  %v1635_v60 = vld [vmem:[#allocation5 + $0x68] sm:$0xff] }
 0x201   :  { %v2367_v30 = vadd.f32 %v857_v63, %v824_v17  ;;  %v1628_v17 = vld [vmem:[#allocation5 + $0x30] sm:$0xff]  ;;  %1256 = vmatpush.bf16.msrb.mxu3 %v1635_v60 }
 0x202   :  { %v939_v11 = vadd.f32 %v938_v2, %v928_v62  ;;  %1221 = vmatpush.bf16.msrb.mxu2 %v1628_v17  ;;  %v1626_v2 = vld [vmem:[#allocation5 + $0x20] sm:$0xff] }
 0x203   :  { %v881_v52 = vsel %vm276_vm0, %v2367_v30, 0.0  ;;  %v755_v53 = vpop.f32.mrf.mxu2  ;;  %v789_v25 = vpop.f32.mrf.mxu3  ;;  %v1622_v17 = vld [vmem:[#allocation5] sm:$0xff] }
 0x204   :  { %v905_v26 = vadd.f32 %v904_v5, %v881_v52  ;;  %v931_v21 = vmul.f32 %v881_v52, %v881_v52  ;;  %v756_v57 = vadd.f32 %v755_v53, %v2260_v35 }
 0x206   :  { %v906_v0 = vrot.slane %v905_v26, 4  ;;  %v955_v31 = vadd.f32 %v954_v23, %v931_v21  ;;  %v2380_v1 = vadd.f32 %v789_v25, %v756_v57  ;;  %1222 = vmatpush.bf16.msrb.mxu2 %v1627_v59 }
 0x208   :  { %v907_v9 = vadd.f32 %v906_v0, %v905_v26  ;;  %v956_v10 = vrot.slane %v955_v31, 4  ;;  %v880_v35 = vsel %vm276_vm0, %v2380_v1, 0.0 }
 0x209   :  { %v890_v15 = vadd.f32 %v889_v3, %v880_v35  ;;  %v930_v18 = vmul.f32 %v880_v35, %v880_v35  ;;  %v1634_v3 = vld [vmem:[#allocation5 + $0x60] sm:$0xff]  ;;  %v1625_v35 = vld [vmem:[#allocation5 + $0x18] sm:$0xff] }
 0x20a   :  { %v908_v13 = vrot.slane %v907_v9, 2  ;;  %v957_v32 = vadd.f32 %v956_v10, %v955_v31  ;;  %1223 = vmatpush.bf16.msrb.mxu2 %v1626_v2  ;;  %1257 = vmatpush.bf16.msrb.mxu3 %v1634_v3 }
 0x20b   :  { %v891_v27 = vrot.slane %v890_v15, 4  ;;  %v940_v37 = vadd.f32 %v939_v11, %v930_v18  ;;  %v1633_v11 = vld [vmem:[#allocation5 + $0x58] sm:$0xff]  ;;  %v1624_v18 = vld [vmem:[#allocation5 + $0x10] sm:$0xff] }
 0x20c   :  { %v909_v39 = vadd.f32 %v908_v13, %v907_v9  ;;  %v958_v28 = vrot.slane %v957_v32, 2  ;;  %v1632_v13 = vld [vmem:[#allocation5 + $0x50] sm:$0xff] }
 0x20d   :  { %v892_v51 = vadd.f32 %v891_v27, %v890_v15  ;;  %v941_v44 = vrot.slane %v940_v37, 4 }
 0x20e   :  { %v910_v41 = vrot.slane %v909_v39, 1  ;;  %v959_v43 = vadd.f32 %v958_v28, %v957_v32  ;;  %1224 = vmatpush.bf16.msrb.mxu2 %v1625_v35  ;;  %1258 = vmatpush.bf16.msrb.mxu3 %v1633_v11 }
 0x20f   :  { %v893_v48 = vrot.slane %v892_v51, 2  ;;  %v942_v55 = vadd.f32 %v941_v44, %v940_v37  ;;  %v1623_v37 = vld [vmem:[#allocation5 + $0x8] sm:$0xff] }
 0x210   :  { %v911_v22 = vadd.f32 %v910_v41, %v909_v39  ;;  %v960_v49 = vrot.slane %v959_v43, 1  ;;  %v1631_v39 = vld [vmem:[#allocation5 + $0x48] sm:$0xff] }
 0x211   :  { %v894_v12 = vadd.f32 %v893_v48, %v892_v51  ;;  %v943_v63 = vrot.slane %v942_v55, 2  ;;  %v1630_v48 = vld [vmem:[#allocation5 + $0x40] sm:$0xff] }
 0x212   :  { %v961_v58 = vadd.f32 %v960_v49, %v959_v43  ;;  %v2386_v7 = vmul.f32 0.013333334, %v911_v22  ;;  %1225 = vmatpush.bf16.msrb.mxu2 %v1624_v18  ;;  %1259 = vmatpush.bf16.msrb.mxu3 %v1632_v13 }
 0x213   :  { %v895_v24 = vrot.slane %v894_v12, 1  ;;  %v944_v5 = vadd.f32 %v943_v63, %v942_v55 }
 0x214   :  { %v965_v16 = vmul.f32 0.013333334, %v961_v58  ;;  %v967_v50 = vmul.f32 %v2386_v7, %v2386_v7 }
 0x215   :  { %v896_v52 = vadd.f32 %v895_v24, %v894_v12  ;;  %v945_v53 = vrot.slane %v944_v5, 1  ;;  %v860_v24 = vld [vmem:[%s2490_s7] sm:$0x3] }
 0x216   :  { %v969_v23 = vsub.f32 %v965_v16, %v967_v50  ;;  %1226 = vmatpush.bf16.msrb.mxu2 %v1623_v37  ;;  %1260 = vmatpush.bf16.msrb.mxu3 %v1631_v39 }
 0x217   :  { %v946_v26 = vadd.f32 %v945_v53, %v944_v5  ;;  %v2390_v21 = vmul.f32 0.013333334, %v896_v52 }
 0x218   :  { %v971_v57 = vmax.f32 %v969_v23, 0.0 }
 0x219   :  { %v964_v62 = vmul.f32 0.013333334, %v946_v26  ;;  %v966_v25 = vmul.f32 %v2390_v21, %v2390_v21  ;;  %v861_v26 = vld [vmem:[%s2491_s8] sm:$0x3] }
 0x21a   :  { %v973_v0 = vadd.f32 1e-05, %v971_v57  ;;  %1227 = vmatpush.bf16.msrb.mxu2 %v1622_v17  ;;  %1261 = vmatpush.bf16.msrb.mxu3 %v1630_v48 }
 0x21b   :  { %v968_v31 = vsub.f32 %v964_v62, %v966_v25 }
 0x21c   :  { %1650 = vrsqrt.f32 %v973_v0  ;;  %vm990_vm9 = vweird.f32 %v973_v0 }
 0x21d   :  { %v970_v9 = vmax.f32 %v968_v31, 0.0 }
 0x21f   :  { %v972_v10 = vadd.f32 1e-05, %v970_v9 }
 0x221   :  { %1652 = vrsqrt.f32 %v972_v10  ;;  %vm980_vm12 = vweird.f32 %v972_v10 }
 0x222   :  { %v1651_v15 = vpop.eup %1650 }
 0x223   :  { %v985_v32 = vmul.f32 %v1651_v15, %v973_v0  ;;  %vm991_vm8 = vweird.f32 %v1651_v15 }
 0x224   :  { %vm992_vm10 = vmor %vm990_vm9, %vm991_vm8 }
 0x225   :  { %v986_v27 = vmul.f32 %v1651_v15, %v985_v32 }
 0x227   :  { %v1653_v28 = vpop.eup %1652  ;;  %v987_v51 = vmul.f32 0.5, %v986_v27 }
 0x228   :  { %v975_v44 = vmul.f32 %v1653_v28, %v972_v10  ;;  %vm981_vm11 = vweird.f32 %v1653_v28 }
 0x229   :  { %v988_v41 = vsub.f32 1.5, %v987_v51  ;;  %vm982_vm13 = vmor %vm980_vm12, %vm981_vm11 }
 0x22a   :  { %v976_v43 = vmul.f32 %v1653_v28, %v975_v44 }
 0x22b   :  { %v989_v55 = vmul.f32 %v1651_v15, %v988_v41 }
 0x22c   :  { %v977_v22 = vmul.f32 0.5, %v976_v43 }
 0x22d   :  { %v993_v49 = vsel %vm992_vm10, %v1651_v15, %v989_v55 }
 0x22e   :  { %v978_v12 = vsub.f32 1.5, %v977_v22  ;;  %v996_v58 = vrot.slane %v993_v49, 7 }
 0x230   :  { %v979_v63 = vmul.f32 %v1653_v28, %v978_v12 }
 0x232   :  { %v983_v5 = vsel %vm982_vm13, %v1653_v28, %v979_v63 }
 0x233   :  { %v997_v16 = vsel %vm434_vm6, %v983_v5, %v996_v58 }
 0x234   :  { %v999_v50 = vmul.f32 %v997_v16, %v860_v24 }
 0x236   :  { %v2398_v20 = vperm.slane %v999_v50, 0  ;;  %v2400_v52 = vperm.slane %v999_v50, 1 }
 0x238   :  { %v1006_v53 = vmul.f32 %v2400_v52, %v2386_v7  ;;  %v1031_v23 = vmul.f32 %v2398_v20, %v2380_v1  ;;  %v1005_v57 = vmul.f32 %v2398_v20, %v2390_v21  ;;  %v1029_v25 = vmul.f32 %v2398_v20, %v2365_v29 }
 0x239   :  { %v1013_v7 = vmul.f32 %v2398_v20, %v2278_v38  ;;  %v1015_v1 = vmul.f32 %v2398_v20, %v2282_v47  ;;  %v1032_v0 = vmul.f32 %v2400_v52, %v2367_v30  ;;  %v1014_v21 = vmul.f32 %v2400_v52, %v2272_v34 }
 0x23a   :  { %v1009_v59 = vrot.slane %v1006_v53, 7  ;;  %v1016_v3 = vmul.f32 %v2400_v52, %v2268_v19  ;;  %v1030_v19 = vmul.f32 %v2400_v52, %v2343_v6  ;;  %v1017_v13 = vmul.f32 %v2398_v20, %v2292_v46 }
 0x23b   :  { %v1019_v32 = vmul.f32 %v2398_v20, %v2309_v14  ;;  %v1018_v27 = vmul.f32 %v2400_v52, %v2274_v36  ;;  %v1020_v39 = vmul.f32 %v2400_v52, %v2284_v42  ;;  %v1021_v24 = vmul.f32 %v2398_v20, %v2320_v54 }
 0x23c   :  { %v1010_v60 = vsel %vm434_vm6, %v1005_v57, %v1009_v59  ;;  %v1023_v5 = vmul.f32 %v2398_v20, %v2335_v4  ;;  %v1022_v16 = vmul.f32 %v2400_v52, %v2294_v8  ;;  %v1024_v50 = vmul.f32 %v2400_v52, %v2311_v45 }
 0x23d   :  { %v1012_v62 = vsub.f32 %v861_v26, %v1010_v60  ;;  %v1025_v8 = vmul.f32 %v2398_v20, %v2347_v33  ;;  %v1027_v45 = vmul.f32 %v2398_v20, %v2356_v40 }
 0x23f   :  { %v2420_v31 = vperm.slane %v1012_v62, 0  ;;  %v2422_v2 = vperm.slane %v1012_v62, 1 }
 0x241   :  { %v1038_v29 = vadd.f32 %v2420_v31, %v1013_v7  ;;  %v1040_v38 = vadd.f32 %v2420_v31, %v1015_v1  ;;  %v1039_v9 = vadd.f32 %v2422_v2, %v1014_v21  ;;  %v1041_v47 = vadd.f32 %v2422_v2, %v1016_v3 }
 0x242   :  { %v1054_v34 = vadd.f32 %v2420_v31, %v1029_v25  ;;  %v1056_v37 = vadd.f32 %v2420_v31, %v1031_v23  ;;  %v1055_v51 = vadd.f32 %v2422_v2, %v1030_v19  ;;  %v1057_v44 = vadd.f32 %v2422_v2, %v1032_v0 }
 0x243   :  { %v1058_v10 = vmax.f32 %v1038_v29, 0.0  ;;  %v1060_v30 = vmax.f32 %v1040_v38, 0.0  ;;  %v1059_v35 = vmax.f32 %v1039_v9, 0.0  ;;  %v1061_v11 = vmax.f32 %v1041_v47, 0.0 }
 0x244   :  { %v1074_v28 = vmax.f32 %v1054_v34, 0.0  ;;  %v1042_v6 = vadd.f32 %v2420_v31, %v1017_v13  ;;  %v1044_v46 = vadd.f32 %v2420_v31, %v1019_v32  ;;  %v1076_v41 = vmax.f32 %v1056_v37, 0.0 }
 0x245   :  { %v1078_v15 = vpack.c.bf16 %v1060_v30, %v1058_v10  ;;  %v1079_v18 = vpack.c.bf16 %v1061_v11, %v1059_v35  ;;  %v1043_v14 = vadd.f32 %v2422_v2, %v1018_v27  ;;  %v1045_v43 = vadd.f32 %v2422_v2, %v1020_v39 }
 0x246   :  { %v1075_v36 = vmax.f32 %v1055_v51, 0.0  ;;  %v1077_v17 = vmax.f32 %v1057_v44, 0.0  ;;  %v1086_v48 = vpack.c.bf16 %v1076_v41, %v1074_v28  ;;  %v1062_v22 = vmax.f32 %v1042_v6, 0.0 }
 0x247   :  { %1228 = vmatmul.bf16.vlgmr.msrb.gmra.mxu2 %v1078_v15  ;;  %1262 = vmatmul.bf16.vlgmr.msrb.gmra.mxu3 %v1079_v18  ;;  %v1064_v42 = vmax.f32 %v1044_v46, 0.0  ;;  %v1063_v49 = vmax.f32 %v1043_v14, 0.0  ;;  %v1065_v12 = vmax.f32 %v1045_v43, 0.0  ;;  %v1046_v53 = vadd.f32 %v2420_v31, %v1021_v24 }
 0x248   :  { %v1087_v55 = vpack.c.bf16 %v1077_v17, %v1075_v36  ;;  %v1048_v23 = vadd.f32 %v2420_v31, %v1023_v5  ;;  %v1047_v26 = vadd.f32 %v2422_v2, %v1022_v16  ;;  %v1049_v57 = vadd.f32 %v2422_v2, %v1024_v50 }
 0x249   :  { %v1080_v63 = vpack.c.bf16 %v1064_v42, %v1062_v22  ;;  %v1081_v58 = vpack.c.bf16 %v1065_v12, %v1063_v49  ;;  %v1066_v59 = vmax.f32 %v1046_v53, 0.0  ;;  %v1026_v7 = vmul.f32 %v2400_v52, %v2322_v56  ;;  %v1645_v56 = vld [vmem:[%s2493_s10] ss:$0 sm:$0xff]  ;;  %s1738_s10 = smov [#allocation7]  }
 0x24a   :  { %v1068_v60 = vmax.f32 %v1048_v23, 0.0  ;;  %v1067_v54 = vmax.f32 %v1047_v26, 0.0  ;;  %v1069_v62 = vmax.f32 %v1049_v57, 0.0  ;;  %v1028_v1 = vmul.f32 %v2400_v52, %v2332_v61  ;;  %s1302_s2 = sshll.u32 %s1738_s10, 4  ;;  %s1303_s2 = int_to_ptr.vmem [resolvable:$true] %s1302_s2 }
 0x24b   :  { %v1050_v0 = vadd.f32 %v2420_v31, %v1025_v8  ;;  %v1052_v21 = vadd.f32 %v2420_v31, %v1027_v45  ;;  %v1051_v3 = vadd.f32 %v2422_v2, %v1026_v7 }
 0x24c   :  { %v1082_v25 = vpack.c.bf16 %v1068_v60, %v1066_v59  ;;  %v1083_v4 = vpack.c.bf16 %v1069_v62, %v1067_v54  ;;  %v1053_v29 = vadd.f32 %v2422_v2, %v1028_v1 }
 0x24d   :  { %v1070_v38 = vmax.f32 %v1050_v0, 0.0  ;;  %v1072_v9 = vmax.f32 %v1052_v21, 0.0  ;;  %v1071_v33 = vmax.f32 %v1051_v3, 0.0 }
 0x24e   :  { %v1073_v47 = vmax.f32 %v1053_v29, 0.0 }
 0x24f   :  { %v1084_v10 = vpack.c.bf16 %v1072_v9, %v1070_v38 }
 0x250   :  { %v1085_v40 = vpack.c.bf16 %v1073_v47, %v1071_v33 }
 0x257   :  { %1233 = vmatmul.bf16.gmra.mxu2 %v1080_v63  ;;  %1267 = vmatmul.bf16.gmra.mxu3 %v1081_v58 }
 0x267   :  { %1238 = vmatmul.bf16.gmra.mxu2 %v1082_v25  ;;  %1272 = vmatmul.bf16.gmra.mxu3 %v1083_v4 }
 0x277   :  { %1243 = vmatmul.bf16.gmra.mxu2 %v1084_v10  ;;  %1277 = vmatmul.bf16.gmra.mxu3 %v1085_v40 }
 0x287   :  { %1248 = vmatmul.bf16.gmra.mxu2 %v1086_v48  ;;  %1282 = vmatmul.bf16.gmra.mxu3 %v1087_v55 }
 0x2ca   :  { %v1229_v61 = vpop.f32.mrf.mxu2  ;;  %v1263_v20 = vpop.f32.mrf.mxu3 }
 0x2cb   :  { %v1230_v52 = vadd.f32 %v1645_v56, %v1229_v61 }
 0x2cd   :  { %v1264_v31 = vadd.f32 %v1263_v20, %v1230_v52 }
 0x2cf   :  { %1288 = vst [vmem:[#allocation7] sm:$0xff] %v1264_v31 }
 0x2d2   :  { %v1231_v2 = vpop.f32.mrf.mxu2  ;;  %v1265_v30 = vpop.f32.mrf.mxu3 }
 0x2d3   :  { %v1232_v35 = vadd.f32 %v1645_v56, %v1231_v2 }
 0x2d5   :  { %v1266_v11 = vadd.f32 %v1265_v30, %v1232_v35 }
 0x2d7   :  { %1289 = vst [vmem:[#allocation7 + $0x8] sm:$0xff] %v1266_v11 }
 0x2da   :  { %v1234_v15 = vpop.f32.mrf.mxu2  ;;  %v1268_v18 = vpop.f32.mrf.mxu3 }
 0x2db   :  { %v1235_v34 = vadd.f32 %v1645_v56, %v1234_v15 }
 0x2dd   :  { %v1269_v19 = vadd.f32 %v1268_v18, %v1235_v34 }
 0x2df   :  { %1290 = vst [vmem:[#allocation7 + $0x10] sm:$0xff] %v1269_v19 }
 0x2e2   :  { %v1236_v13 = vpop.f32.mrf.mxu2  ;;  %v1270_v32 = vpop.f32.mrf.mxu3 }
 0x2e3   :  { %v1237_v27 = vadd.f32 %v1645_v56, %v1236_v13 }
 0x2e5   :  { %v1271_v37 = vadd.f32 %v1270_v32, %v1237_v27 }
 0x2e7   :  { %1291 = vst [vmem:[#allocation7 + $0x18] sm:$0xff] %v1271_v37 }
 0x2ea   :  { %v1239_v39 = vpop.f32.mrf.mxu2  ;;  %v1273_v28 = vpop.f32.mrf.mxu3 }
 0x2eb   :  { %v1240_v51 = vadd.f32 %v1645_v56, %v1239_v39 }
 0x2ed   :  { %v1274_v44 = vadd.f32 %v1273_v28, %v1240_v51 }
 0x2ef   :  { %1292 = vst [vmem:[#allocation7 + $0x20] sm:$0xff] %v1274_v44 }
 0x2f2   :  { %v1241_v6 = vpop.f32.mrf.mxu2  ;;  %v1275_v46 = vpop.f32.mrf.mxu3 }
 0x2f3   :  { %v1242_v41 = vadd.f32 %v1645_v56, %v1241_v6 }
 0x2f5   :  { %v1276_v14 = vadd.f32 %v1275_v46, %v1242_v41 }
 0x2f7   :  { %1293 = vst [vmem:[#allocation7 + $0x28] sm:$0xff] %v1276_v14 }
 0x2fa   :  { %v1244_v43 = vpop.f32.mrf.mxu2  ;;  %v1278_v36 = vpop.f32.mrf.mxu3 }
 0x2fb   :  { %v1245_v17 = vadd.f32 %v1645_v56, %v1244_v43 }
 0x2fd   :  { %v1279_v48 = vadd.f32 %v1278_v36, %v1245_v17 }
 0x2ff   :  { %1294 = vst [vmem:[#allocation7 + $0x30] sm:$0xff] %v1279_v48 }
 0x302   :  { %v1246_v55 = vpop.f32.mrf.mxu2  ;;  %v1280_v22 = vpop.f32.mrf.mxu3 }
 0x303   :  { %v1247_v42 = vadd.f32 %v1645_v56, %v1246_v55 }
 0x305   :  { %v1281_v49 = vadd.f32 %v1280_v22, %v1247_v42 }
 0x307   :  { %1295 = vst [vmem:[#allocation7 + $0x38] sm:$0xff] %v1281_v49 }
 0x30a   :  { %v1249_v12 = vpop.f32.mrf.mxu2  ;;  %v1283_v63 = vpop.f32.mrf.mxu3 }
 0x30b   :  { %v1250_v58 = vadd.f32 %v1645_v56, %v1249_v12 }
 0x30d   :  { %v1284_v24 = vadd.f32 %v1283_v63, %v1250_v58 }
 0x30f   :  { %1296 = vst [vmem:[#allocation7 + $0x40] sm:$0xff] %v1284_v24 }
 0x312   :  { %v1251_v5 = vpop.f32.mrf.mxu2  ;;  %v1285_v50 = vpop.f32.mrf.mxu3 }
 0x313   :  { %v1252_v16 = vadd.f32 %v1645_v56, %v1251_v5 }
 0x315   :  { %v1286_v53 = vadd.f32 %v1285_v50, %v1252_v16 }
 0x317   :  { %1297 = vst [vmem:[#allocation7 + $0x48] sm:$0xff] %v1286_v53 }
 0x318   :  { %1310 = dma.vmem_to_hbm [thread:$0]  %s1303_s2, 1280, %s1305_s22, [#allocation4], %s1733_s25, %s1733_s25, %s1734_s26  }
 0x319   :  { %1730 = dma.done.wait [#allocation4], 1280  }
 0x31a   :  { %1731 = vsyncadd [#allocation4], 4294966016 }
 0x31b   :  { %1315 = vsyncpa [#allocation3], 1 }
 0x31c   :  { %1316 = vsyncpa [#allocation6], 1 }
 0x31d   :  { %1317 = vsyncpa [#allocation4], 1 }

</bundles_post_ra>
